<compile_context>
chip_gen: v5e
topology: v5e:2x2
jax: 0.10.0
libtpu: 0.0.40
codegen_flags: <defaults>
</compile_context>

<pallas_src>
import functools

import jax
import jax.numpy as jnp
from jax import lax
from jax.experimental import pallas as pl
from jax.experimental.pallas import tpu as pltpu


# ---------------------------------------------------------------------------
# Phase 1: batched input projection + LSTM recurrence (gridded over batch chunks).
# ---------------------------------------------------------------------------
def lstm_kernel(emb_ref, mask_ref, wih_ref, whh_ref, b_ref, h_out_ref, xw_ref,
                *, T, bb, unroll_limit=32):
    """One grid step = one batch chunk of `bb` sequences (rows are time-major
       inside the chunk: row = t*bb + b_in_chunk).
       emb_ref:   (T*bb, E)  bf16
       mask_ref:  (T*bb, 1)  f32   1.0 where t < len-1
       wih_ref:   (E, 4H)    bf16  resident
       whh_ref:   (H, 4H)    bf16  resident across all steps
       b_ref:     (1, 4H)    f32   (b_ih + b_hh)
       h_out_ref: (T*bb, H)  bf16  masked hidden states (zero past each length)
       xw_ref:    (T*bb, 4H) f32   scratch (used only on the fori_loop path)."""
    H = whh_ref.shape[0]

    # Hoisted input projection: one large (T*bb, E) x (E, 4H) MXU matmul; bias once.
    gate_proj = jnp.dot(emb_ref[...], wih_ref[...],
                        preferred_element_type=jnp.float32) + b_ref[...]   # (T*bb, 4H)
    whh = whh_ref[...]                                                     # bf16, resident

    h0 = jnp.zeros((bb, H), jnp.float32)
    c0 = jnp.zeros((bb, H), jnp.float32)

    def step(x_g, m_t, h, c):
        gates = x_g + jnp.dot(h.astype(jnp.bfloat16), whh,
                              preferred_element_type=jnp.float32)          # (bb, 4H)
        i_g = jax.nn.sigmoid(gates[:, 0 * H:1 * H])
        f_g = jax.nn.sigmoid(gates[:, 1 * H:2 * H])
        g_g = jnp.tanh(gates[:, 2 * H:3 * H])
        o_g = jax.nn.sigmoid(gates[:, 3 * H:4 * H])
        c_new = f_g * c + i_g * g_g
        h_new = o_g * jnp.tanh(c_new)
        # freeze (h, c) past each sequence length; emitted rows there are zero.
        c = m_t * c_new + (1.0 - m_t) * c
        h = m_t * h_new + (1.0 - m_t) * h
        return h, c, m_t * h_new

    if T <= unroll_limit:
        # Small T: static unroll, everything held as values (compiler-managed).
        xw = gate_proj
        mask = mask_ref[...]
        h, c = h0, c0
        for t in range(T):
            x_g = xw[t * bb:(t + 1) * bb]
            m_t = mask[t * bb:(t + 1) * bb]
            h, c, out = step(x_g, m_t, h, c)
            h_out_ref[t * bb:(t + 1) * bb, :] = out.astype(h_out_ref.dtype)
    else:
        # Large T: constant instruction footprint via fori_loop, xw in VMEM scratch.
        xw_ref[...] = gate_proj

        def body(t, carry):
            h, c = carry
            r = pl.multiple_of(t * bb, bb)
            x_g = xw_ref[pl.ds(r, bb), :]
            m_t = mask_ref[pl.ds(r, bb), :]
            h, c, out = step(x_g, m_t, h, c)
            h_out_ref[pl.ds(r, bb), :] = out.astype(h_out_ref.dtype)
            return (h, c)

        lax.fori_loop(0, T, body, (h0, c0))


# ---------------------------------------------------------------------------
# Phase 2: fused (affine @ decoder) matmul -> online log_softmax.
# ---------------------------------------------------------------------------
def decoder_kernel(h_ref, wf_ref, bf_ref, scores_ref, m_sc, l_sc):
    """Grid = (T*B // tm, V // tv); the V axis is innermost ("arbitrary").
       h_ref:      (tm, H) bf16   row tile of masked hidden states
       wf_ref:     (H, tv) bf16   fused waff@wdec weight, streamed over V tiles
       bf_ref:     (1, V)  f32    fused bias, resident
       scores_ref: (tm, V) f32    VMEM-resident output block across the V axis
       m_sc, l_sc: (tm, 1) f32    online log-softmax running max / exp-sum."""
    j = pl.program_id(1)
    nj = pl.num_programs(1)
    tv = wf_ref.shape[1]

    @pl.when(j == 0)
    def _():
        m_sc[...] = jnp.full(m_sc.shape, -jnp.inf, m_sc.dtype)
        l_sc[...] = jnp.zeros(l_sc.shape, l_sc.dtype)

    col = j * tv
    if tv % 128 == 0:                       # only hint when it is actually true
        col = pl.multiple_of(col, 128)

    logits = jnp.dot(h_ref[...], wf_ref[...],
                     preferred_element_type=jnp.float32)                  # (tm, tv)
    logits = logits + bf_ref[:, pl.ds(col, tv)]
    scores_ref[:, pl.ds(col, tv)] = logits

    # Online max / exp-sum per tile: EUP work overlaps the next weight-tile DMA.
    m_new = jnp.maximum(m_sc[...], jnp.max(logits, axis=-1, keepdims=True))
    l_sc[...] = (l_sc[...] * jnp.exp(m_sc[...] - m_new)
                 + jnp.sum(jnp.exp(logits - m_new), axis=-1, keepdims=True))
    m_sc[...] = m_new

    @pl.when(j == nj - 1)
    def _():
        # Only a broadcast subtraction left at the end (lse = m + log(l)).
        scores_ref[...] = scores_ref[...] - (m_sc[...] + jnp.log(l_sc[...]))


# ---------------------------------------------------------------------------
# Tiling heuristics.
# ---------------------------------------------------------------------------
def _pick_tile(n, candidates):
    for c in candidates:
        if c <= n and n % c == 0:
            return c
    return n


def _pick_batch_chunk(B, T, E, H, budget=16 * 1024 * 1024):
    """Batch chunk for Phase 1: >=2 grid steps enables megacore on v7x, chunk
       rows are a multiple of 8 sublanes, and the per-chunk working set stays
       well under scoped VMEM."""
    def chunk_bytes(bb):
        rows = T * bb
        return rows * (2 * E * 2 + 4 * H * 4 + 2 * H * 2 + 4)  # emb(x2)+xw+h_out(x2)+mask
    for bb in (64, 32, 16, 8):
        if B % bb == 0 and B // bb >= 2 and chunk_bytes(bb) <= budget:
            return bb
    # TODO(synk): for very long T, also stream the hoisted xW over time chunks
    # (emit_pipeline) instead of holding the whole chunk in VMEM.
    return B


def _pick_decoder_tiles(TB, V, budget=20 * 1024 * 1024):
    """Large vocab tile (amortizes grid-step overhead / DMA) and the largest row
       tile whose double-buffered resident (tm, V) f32 scores block fits."""
    tv = _pick_tile(V, (2048, 1024, 512, 256, 128))
    cands = [c for c in (512, 256, 128, 64, 32, 16, 8) if c <= TB and TB % c == 0]
    for c in cands:
        if 2 * c * V * 4 <= budget:
            return c, tv
    # TODO(synk): on v7x / very large vocab, switch to streamed (tm, tv) output
    # tiles + two-pass online log-softmax instead of the resident (tm, V) block.
    return (cands[-1] if cands else TB), tv


# ---------------------------------------------------------------------------
# Forward wrapper.
# ---------------------------------------------------------------------------
def language_model_forward(params, input_feats, lens):
    """Equivalent of LanguageModel.forward (eval mode: dropout = identity)."""
    x = input_feats[:, :-1]                                   # (B, T)
    lens_m1 = lens - 1

    # Embedding gather in bf16 (table cast once; halves gather HBM traffic).
    emb_table = params["emb"].astype(jnp.bfloat16)
    emb = jnp.take(emb_table, x, axis=0)                      # (B, T, E) bf16
    B, T, E = emb.shape
    H = params["whh"].shape[0]
    V = params["wdec"].shape[1]
    TB = T * B

    bb = _pick_batch_chunk(B, T, E, H)
    nb = B // bb

    # Chunk-major, per-chunk time-major layout: row = (chunk*T + t)*bb + b_in_chunk.
    emb_cm = emb.reshape(nb, bb, T, E).transpose(0, 2, 1, 3).reshape(TB, E)
    mask_bt = (jnp.arange(T)[None, :] < lens_m1[:, None]).astype(jnp.float32)  # (B, T)
    mask_cm = mask_bt.reshape(nb, bb, T).transpose(0, 2, 1).reshape(TB, 1)

    wih = params["wih"].astype(jnp.bfloat16)
    whh = params["whh"].astype(jnp.bfloat16)

    # ---- Phase 1: hoisted input projection + recurrence, gridded over batch ----
    h_out = pl.pallas_call(
        functools.partial(lstm_kernel, T=T, bb=bb),
        out_shape=jax.ShapeDtypeStruct((TB, H), jnp.bfloat16),
        grid_spec=pltpu.PrefetchScalarGridSpec(
            num_scalar_prefetch=0,
            grid=(nb,),
            in_specs=[
                pl.BlockSpec((T * bb, E), lambda i: (i, 0)),   # emb chunk
                pl.BlockSpec((T * bb, 1), lambda i: (i, 0)),   # mask chunk
                pl.BlockSpec((E, 4 * H), lambda i: (0, 0)),    # wih resident
                pl.BlockSpec((H, 4 * H), lambda i: (0, 0)),    # whh resident
                pl.BlockSpec((1, 4 * H), lambda i: (0, 0)),    # bias
            ],
            out_specs=pl.BlockSpec((T * bb, H), lambda i: (i, 0)),
            scratch_shapes=[pltpu.VMEM((T * bb, 4 * H), jnp.float32)],
        ),
        compiler_params=pltpu.CompilerParams(
            dimension_semantics=("parallel",),
            vmem_limit_bytes=32 * 1024 * 1024),
    )(emb_cm, mask_cm, wih, whh, params["b"])

    # ---- Offline affine+decoder fusion (eval mode: no dropout between Linears) ----
    #   (h @ waff + baff) @ wdec + bdec  ==  h @ (waff @ wdec) + (baff @ wdec + bdec)
    wf = jnp.dot(params["waff"], params["wdec"],
                 precision=lax.Precision.HIGHEST).astype(jnp.bfloat16)      # (H, V)
    bf = jnp.dot(params["baff"], params["wdec"],
                 precision=lax.Precision.HIGHEST) + params["bdec"]          # (1, V) f32

    # ---- Phase 2: fused matmul -> online log_softmax ----
    tm, tv = _pick_decoder_tiles(TB, V)
    scores_flat = pl.pallas_call(
        decoder_kernel,
        out_shape=jax.ShapeDtypeStruct((TB, V), jnp.float32),
        grid_spec=pltpu.PrefetchScalarGridSpec(
            num_scalar_prefetch=0,
            grid=(TB // tm, V // tv),
            in_specs=[
                pl.BlockSpec((tm, H), lambda i, j: (i, 0)),    # h rows (bf16)
                pl.BlockSpec((H, tv), lambda i, j: (0, j)),    # fused weight over V
                pl.BlockSpec((1, V), lambda i, j: (0, 0)),     # fused bias, resident
            ],
            out_specs=pl.BlockSpec((tm, V), lambda i, j: (i, 0)),  # resident over j
            scratch_shapes=[pltpu.VMEM((tm, 1), jnp.float32),
                            pltpu.VMEM((tm, 1), jnp.float32)],
        ),
        compiler_params=pltpu.CompilerParams(
            dimension_semantics=("parallel", "arbitrary"),
            vmem_limit_bytes=32 * 1024 * 1024),
    )(h_out, wf, bf)

    # chunk-major (TB, V) -> (B, T, V) batch-first
    return scores_flat.reshape(nb, T, bb, V).transpose(0, 2, 1, 3).reshape(B, T, V)


# ---------------------------------------------------------------------------
# Params + pure-JAX reference.
# ---------------------------------------------------------------------------
def init_params(key, vocab_size, emb_size, hidden_dim, init=0.2):
    """Deterministic uniform(-init, init) init, mirroring the PyTorch module."""
    ks = jax.random.split(key, 10)
    u = lambda k, shape: jax.random.uniform(k, shape, jnp.float32, -init, init)
    H = hidden_dim
    return {
        "emb":  u(ks[0], (vocab_size, emb_size)),             # encoder.weight
        "wih":  u(ks[1], (emb_size, 4 * H)),                  # rnn.weight_ih_l0^T
        "whh":  u(ks[2], (H, 4 * H)),                         # rnn.weight_hh_l0^T
        "b":    u(ks[3], (1, 4 * H)) + u(ks[4], (1, 4 * H)),  # b_ih + b_hh
        "waff": u(ks[5], (H, emb_size)),                      # affine.weight^T
        "baff": u(ks[6], (1, emb_size)),                      # affine.bias
        "wdec": u(ks[7], (emb_size, vocab_size)),             # decoder.weight^T
        "bdec": u(ks[8], (1, vocab_size)),                    # decoder.bias
    }


def reference_forward(params, input_feats, lens):
    """Pure-JAX f32 reference mirroring LanguageModel.forward (eval mode)."""
    x = input_feats[:, :-1]
    lens_m1 = lens - 1
    emb = jnp.take(params["emb"], x, axis=0)                  # (B, T, E)
    B, T, _ = emb.shape
    H = params["whh"].shape[0]
    h = jnp.zeros((B, H), jnp.float32)
    c = jnp.zeros((B, H), jnp.float32)
    outs = []
    for t in range(T):
        m = (t < lens_m1).astype(jnp.float32)[:, None]
        gates = emb[:, t] @ params["wih"] + h @ params["whh"] + params["b"]
        i_g = jax.nn.sigmoid(gates[:, 0 * H:1 * H])
        f_g = jax.nn.sigmoid(gates[:, 1 * H:2 * H])
        g_g = jnp.tanh(gates[:, 2 * H:3 * H])
        o_g = jax.nn.sigmoid(gates[:, 3 * H:4 * H])
        c_new = f_g * c + i_g * g_g
        h_new = o_g * jnp.tanh(c_new)
        c = m * c_new + (1.0 - m) * c
        h = m * h_new + (1.0 - m) * h
        outs.append(m * h_new)
    out = jnp.stack(outs, axis=1)                             # (B, T, H)
    dec = (out @ params["waff"] + params["baff"]) @ params["wdec"] + params["bdec"]
    return jax.nn.log_softmax(dec, axis=-1)


if __name__ == "__main__":
    # Small shapes consistent with the module: vocab=512, emb=128, hidden=128,
    # batch=2, raw seq len=9 (-> T=8 after dropping the last token).
    VOCAB, EMB, HID = 512, 128, 128
    B, S = 2, 9

    key = jax.random.PRNGKey(0)
    k_p, k_x = jax.random.split(key)
    params = init_params(k_p, VOCAB, EMB, HID, init=0.2)

    input_feats = jax.random.randint(k_x, (B, S), 0, VOCAB, dtype=jnp.int32)
    # TODO(synk): the dynamic-shape case max(lens-1) < T (pad_packed shortening
    # the output) is not modeled here; rows past each length hold
    # log_softmax(b_fused), matching pad_packed + decoder semantics.
    lens = jnp.array([S, 6], dtype=jnp.int32)

    scores = jax.block_until_ready(language_model_forward(params, input_feats, lens))

    assert scores.shape == (B, S - 1, VOCAB)
    assert bool(jnp.all(jnp.isfinite(scores)))
    # log_softmax rows normalize to 1 in probability space.
    assert bool(jnp.allclose(jnp.sum(jnp.exp(scores), axis=-1), 1.0, atol=1e-3))
    # matches the pure-JAX f32 reference up to bf16 matmul error.
    ref = reference_forward(params, input_feats, lens)
    err = float(jnp.max(jnp.abs(scores - ref)))
    assert bool(jnp.allclose(scores, ref, atol=5e-2)), err
    print("KERNEL_OK")
</pallas_src>

<mosaic_0001>
module attributes {stable_mosaic.version = 11 : i64} {
  func.func @lstm_kernel(%arg0: i32, %arg1: memref<16x128xbf16, #tpu.memory_space<vmem>>, %arg2: memref<16x1xf32, #tpu.memory_space<vmem>>, %arg3: memref<128x512xbf16, #tpu.memory_space<vmem>>, %arg4: memref<128x512xbf16, #tpu.memory_space<vmem>>, %arg5: memref<1x512xf32, #tpu.memory_space<vmem>>, %arg6: memref<16x128xbf16, #tpu.memory_space<vmem>>, %arg7: memref<16x512xf32, #tpu.memory_space<vmem>>) attributes {dimension_semantics = [#tpu.dimension_semantics<parallel>], iteration_bounds = array<i64: 1>, scalar_prefetch = 0 : i64, scratch_operands = 1 : i64, tpu.core_type = #tpu.core_type<tc>, window_params = [{transform_indices = @transform_0, window_bounds = array<i64: 16, 128>}, {transform_indices = @transform_1, window_bounds = array<i64: 16, 1>}, {pipeline_mode = #tpu.pipeline_mode<synchronous>, transform_indices = @transform_2, window_bounds = array<i64: 128, 512>}, {pipeline_mode = #tpu.pipeline_mode<synchronous>, transform_indices = @transform_3, window_bounds = array<i64: 128, 512>}, {pipeline_mode = #tpu.pipeline_mode<synchronous>, transform_indices = @transform_4, window_bounds = array<i64: 1, 512>}, {transform_indices = @transform_5, window_bounds = array<i64: 16, 128>}]} {
    %c0 = arith.constant 0 : index
    %c0_0 = arith.constant 0 : index
    %0 = vector.load %arg1[%c0, %c0_0] : memref<16x128xbf16, #tpu.memory_space<vmem>>, vector<16x128xbf16>
    %c0_1 = arith.constant 0 : index
    %c0_2 = arith.constant 0 : index
    %1 = vector.load %arg3[%c0_1, %c0_2] : memref<128x512xbf16, #tpu.memory_space<vmem>>, vector<128x512xbf16>
    %cst = arith.constant dense<0.000000e+00> : vector<16x512xf32>
    %2 = tpu.matmul %0, %1, %cst {dimension_numbers = #tpu.dot_dimension_numbers<[1], [0], [0], [1], [0, 0, 1, 1], [], []>} : vector<16x128xbf16>, vector<128x512xbf16>, vector<16x512xf32> -> vector<16x512xf32>
    %c0_3 = arith.constant 0 : index
    %c0_4 = arith.constant 0 : index
    %3 = vector.load %arg5[%c0_3, %c0_4] : memref<1x512xf32, #tpu.memory_space<vmem>>, vector<1x512xf32>
    %4 = vector.broadcast %3 : vector<1x512xf32> to vector<16x512xf32>
    %5 = arith.addf %2, %4 : vector<16x512xf32>
    %c0_5 = arith.constant 0 : index
    %c0_6 = arith.constant 0 : index
    %6 = vector.load %arg4[%c0_5, %c0_6] : memref<128x512xbf16, #tpu.memory_space<vmem>>, vector<128x512xbf16>
    %cst_7 = arith.constant 0.000000e+00 : f32
    %7 = vector.broadcast %cst_7 : f32 to vector<2x128xf32>
    %cst_8 = arith.constant 0.000000e+00 : f32
    %8 = vector.broadcast %cst_8 : f32 to vector<2x128xf32>
    %c0_9 = arith.constant 0 : index
    %c0_10 = arith.constant 0 : index
    %9 = vector.load %arg2[%c0_9, %c0_10] : memref<16x1xf32, #tpu.memory_space<vmem>>, vector<16x1xf32>
    %10 = vector.extract_strided_slice %5 {offsets = [0, 0], sizes = [2, 512], strides = [1, 1]} : vector<16x512xf32> to vector<2x512xf32>
    %11 = vector.extract_strided_slice %9 {offsets = [0, 0], sizes = [2, 1], strides = [1, 1]} : vector<16x1xf32> to vector<2x1xf32>
    %12 = arith.truncf %7 : vector<2x128xf32> to vector<2x128xbf16>
    %cst_11 = arith.constant dense<0.000000e+00> : vector<2x512xf32>
    %13 = tpu.matmul %12, %6, %cst_11 {dimension_numbers = #tpu.dot_dimension_numbers<[1], [0], [0], [1], [0, 0, 1, 1], [], []>} : vector<2x128xbf16>, vector<128x512xbf16>, vector<2x512xf32> -> vector<2x512xf32>
    %14 = arith.addf %10, %13 : vector<2x512xf32>
    %15 = vector.extract_strided_slice %14 {offsets = [0, 0], sizes = [2, 128], strides = [1, 1]} : vector<2x512xf32> to vector<2x128xf32>
    %16 = arith.negf %15 : vector<2x128xf32>
    %17 = math.exp %16 : vector<2x128xf32>
    %cst_12 = arith.constant 1.000000e+00 : f32
    %18 = vector.broadcast %cst_12 : f32 to vector<2x128xf32>
    %19 = arith.addf %18, %17 : vector<2x128xf32>
    %20 = arith.divf %18, %19 : vector<2x128xf32>
    %21 = vector.extract_strided_slice %14 {offsets = [0, 128], sizes = [2, 128], strides = [1, 1]} : vector<2x512xf32> to vector<2x128xf32>
    %22 = arith.negf %21 : vector<2x128xf32>
    %23 = math.exp %22 : vector<2x128xf32>
    %cst_13 = arith.constant 1.000000e+00 : f32
    %24 = vector.broadcast %cst_13 : f32 to vector<2x128xf32>
    %25 = arith.addf %24, %23 : vector<2x128xf32>
    %26 = arith.divf %24, %25 : vector<2x128xf32>
    %27 = vector.extract_strided_slice %14 {offsets = [0, 256], sizes = [2, 128], strides = [1, 1]} : vector<2x512xf32> to vector<2x128xf32>
    %28 = math.tanh %27 : vector<2x128xf32>
    %29 = vector.extract_strided_slice %14 {offsets = [0, 384], sizes = [2, 128], strides = [1, 1]} : vector<2x512xf32> to vector<2x128xf32>
    %30 = arith.negf %29 : vector<2x128xf32>
    %31 = math.exp %30 : vector<2x128xf32>
    %cst_14 = arith.constant 1.000000e+00 : f32
    %32 = vector.broadcast %cst_14 : f32 to vector<2x128xf32>
    %33 = arith.addf %32, %31 : vector<2x128xf32>
    %34 = arith.divf %32, %33 : vector<2x128xf32>
    %35 = arith.mulf %26, %8 : vector<2x128xf32>
    %36 = arith.mulf %20, %28 : vector<2x128xf32>
    %37 = arith.addf %35, %36 : vector<2x128xf32>
    %38 = math.tanh %37 : vector<2x128xf32>
    %39 = arith.mulf %34, %38 : vector<2x128xf32>
    %40 = vector.broadcast %11 : vector<2x1xf32> to vector<2x128xf32>
    %41 = arith.mulf %40, %37 : vector<2x128xf32>
    %cst_15 = arith.constant 1.000000e+00 : f32
    %42 = vector.broadcast %cst_15 : f32 to vector<2x1xf32>
    %43 = arith.subf %42, %11 : vector<2x1xf32>
    %44 = vector.broadcast %43 : vector<2x1xf32> to vector<2x128xf32>
    %45 = arith.mulf %44, %8 : vector<2x128xf32>
    %46 = arith.addf %41, %45 : vector<2x128xf32>
    %47 = vector.broadcast %11 : vector<2x1xf32> to vector<2x128xf32>
    %48 = arith.mulf %47, %39 : vector<2x128xf32>
    %cst_16 = arith.constant 1.000000e+00 : f32
    %49 = vector.broadcast %cst_16 : f32 to vector<2x1xf32>
    %50 = arith.subf %49, %11 : vector<2x1xf32>
    %51 = vector.broadcast %50 : vector<2x1xf32> to vector<2x128xf32>
    %52 = arith.mulf %51, %7 : vector<2x128xf32>
    %53 = arith.addf %48, %52 : vector<2x128xf32>
    %54 = vector.broadcast %11 : vector<2x1xf32> to vector<2x128xf32>
    %55 = arith.mulf %54, %39 : vector<2x128xf32>
    %56 = arith.truncf %55 : vector<2x128xf32> to vector<2x128xbf16>
    %c0_17 = arith.constant 0 : index
    %c0_18 = arith.constant 0 : index
    %57 = vector.load %arg6[%c0_17, %c0_18] : memref<16x128xbf16, #tpu.memory_space<vmem>>, vector<2x128xbf16>
    tpu.vector_store %arg6[%c0_17, %c0_18], %56 {strides = array<i32>} : memref<16x128xbf16, #tpu.memory_space<vmem>>, vector<2x128xbf16>,
    %58 = vector.extract_strided_slice %5 {offsets = [2, 0], sizes = [2, 512], strides = [1, 1]} : vector<16x512xf32> to vector<2x512xf32>
    %59 = vector.extract_strided_slice %9 {offsets = [2, 0], sizes = [2, 1], strides = [1, 1]} : vector<16x1xf32> to vector<2x1xf32>
    %60 = arith.truncf %53 : vector<2x128xf32> to vector<2x128xbf16>
    %cst_19 = arith.constant dense<0.000000e+00> : vector<2x512xf32>
    %61 = tpu.matmul %60, %6, %cst_19 {dimension_numbers = #tpu.dot_dimension_numbers<[1], [0], [0], [1], [0, 0, 1, 1], [], []>} : vector<2x128xbf16>, vector<128x512xbf16>, vector<2x512xf32> -> vector<2x512xf32>
    %62 = arith.addf %58, %61 : vector<2x512xf32>
    %63 = vector.extract_strided_slice %62 {offsets = [0, 0], sizes = [2, 128], strides = [1, 1]} : vector<2x512xf32> to vector<2x128xf32>
    %64 = arith.negf %63 : vector<2x128xf32>
    %65 = math.exp %64 : vector<2x128xf32>
    %cst_20 = arith.constant 1.000000e+00 : f32
    %66 = vector.broadcast %cst_20 : f32 to vector<2x128xf32>
    %67 = arith.addf %66, %65 : vector<2x128xf32>
    %68 = arith.divf %66, %67 : vector<2x128xf32>
    %69 = vector.extract_strided_slice %62 {offsets = [0, 128], sizes = [2, 128], strides = [1, 1]} : vector<2x512xf32> to vector<2x128xf32>
    %70 = arith.negf %69 : vector<2x128xf32>
    %71 = math.exp %70 : vector<2x128xf32>
    %cst_21 = arith.constant 1.000000e+00 : f32
    %72 = vector.broadcast %cst_21 : f32 to vector<2x128xf32>
    %73 = arith.addf %72, %71 : vector<2x128xf32>
    %74 = arith.divf %72, %73 : vector<2x128xf32>
    %75 = vector.extract_strided_slice %62 {offsets = [0, 256], sizes = [2, 128], strides = [1, 1]} : vector<2x512xf32> to vector<2x128xf32>
    %76 = math.tanh %75 : vector<2x128xf32>
    %77 = vector.extract_strided_slice %62 {offsets = [0, 384], sizes = [2, 128], strides = [1, 1]} : vector<2x512xf32> to vector<2x128xf32>
    %78 = arith.negf %77 : vector<2x128xf32>
    %79 = math.exp %78 : vector<2x128xf32>
    %cst_22 = arith.constant 1.000000e+00 : f32
    %80 = vector.broadcast %cst_22 : f32 to vector<2x128xf32>
    %81 = arith.addf %80, %79 : vector<2x128xf32>
    %82 = arith.divf %80, %81 : vector<2x128xf32>
    %83 = arith.mulf %74, %46 : vector<2x128xf32>
    %84 = arith.mulf %68, %76 : vector<2x128xf32>
    %85 = arith.addf %83, %84 : vector<2x128xf32>
    %86 = math.tanh %85 : vector<2x128xf32>
    %87 = arith.mulf %82, %86 : vector<2x128xf32>
    %88 = vector.broadcast %59 : vector<2x1xf32> to vector<2x128xf32>
    %89 = arith.mulf %88, %85 : vector<2x128xf32>
    %cst_23 = arith.constant 1.000000e+00 : f32
    %90 = vector.broadcast %cst_23 : f32 to vector<2x1xf32>
    %91 = arith.subf %90, %59 : vector<2x1xf32>
    %92 = vector.broadcast %91 : vector<2x1xf32> to vector<2x128xf32>
    %93 = arith.mulf %92, %46 : vector<2x128xf32>
    %94 = arith.addf %89, %93 : vector<2x128xf32>
    %95 = vector.broadcast %59 : vector<2x1xf32> to vector<2x128xf32>
    %96 = arith.mulf %95, %87 : vector<2x128xf32>
    %cst_24 = arith.constant 1.000000e+00 : f32
    %97 = vector.broadcast %cst_24 : f32 to vector<2x1xf32>
    %98 = arith.subf %97, %59 : vector<2x1xf32>
    %99 = vector.broadcast %98 : vector<2x1xf32> to vector<2x128xf32>
    %100 = arith.mulf %99, %53 : vector<2x128xf32>
    %101 = arith.addf %96, %100 : vector<2x128xf32>
    %102 = vector.broadcast %59 : vector<2x1xf32> to vector<2x128xf32>
    %103 = arith.mulf %102, %87 : vector<2x128xf32>
    %104 = arith.truncf %103 : vector<2x128xf32> to vector<2x128xbf16>
    %c2 = arith.constant 2 : index
    %c0_25 = arith.constant 0 : index
    %105 = vector.load %arg6[%c2, %c0_25] : memref<16x128xbf16, #tpu.memory_space<vmem>>, vector<2x128xbf16>
    tpu.vector_store %arg6[%c2, %c0_25], %104 {strides = array<i32>} : memref<16x128xbf16, #tpu.memory_space<vmem>>, vector<2x128xbf16>,
    %106 = vector.extract_strided_slice %5 {offsets = [4, 0], sizes = [2, 512], strides = [1, 1]} : vector<16x512xf32> to vector<2x512xf32>
    %107 = vector.extract_strided_slice %9 {offsets = [4, 0], sizes = [2, 1], strides = [1, 1]} : vector<16x1xf32> to vector<2x1xf32>
    %108 = arith.truncf %101 : vector<2x128xf32> to vector<2x128xbf16>
    %cst_26 = arith.constant dense<0.000000e+00> : vector<2x512xf32>
    %109 = tpu.matmul %108, %6, %cst_26 {dimension_numbers = #tpu.dot_dimension_numbers<[1], [0], [0], [1], [0, 0, 1, 1], [], []>} : vector<2x128xbf16>, vector<128x512xbf16>, vector<2x512xf32> -> vector<2x512xf32>
    %110 = arith.addf %106, %109 : vector<2x512xf32>
    %111 = vector.extract_strided_slice %110 {offsets = [0, 0], sizes = [2, 128], strides = [1, 1]} : vector<2x512xf32> to vector<2x128xf32>
    %112 = arith.negf %111 : vector<2x128xf32>
    %113 = math.exp %112 : vector<2x128xf32>
    %cst_27 = arith.constant 1.000000e+00 : f32
    %114 = vector.broadcast %cst_27 : f32 to vector<2x128xf32>
    %115 = arith.addf %114, %113 : vector<2x128xf32>
    %116 = arith.divf %114, %115 : vector<2x128xf32>
    %117 = vector.extract_strided_slice %110 {offsets = [0, 128], sizes = [2, 128], strides = [1, 1]} : vector<2x512xf32> to vector<2x128xf32>
    %118 = arith.negf %117 : vector<2x128xf32>
    %119 = math.exp %118 : vector<2x128xf32>
    %cst_28 = arith.constant 1.000000e+00 : f32
    %120 = vector.broadcast %cst_28 : f32 to vector<2x128xf32>
    %121 = arith.addf %120, %119 : vector<2x128xf32>
    %122 = arith.divf %120, %121 : vector<2x128xf32>
    %123 = vector.extract_strided_slice %110 {offsets = [0, 256], sizes = [2, 128], strides = [1, 1]} : vector<2x512xf32> to vector<2x128xf32>
    %124 = math.tanh %123 : vector<2x128xf32>
    %125 = vector.extract_strided_slice %110 {offsets = [0, 384], sizes = [2, 128], strides = [1, 1]} : vector<2x512xf32> to vector<2x128xf32>
    %126 = arith.negf %125 : vector<2x128xf32>
    %127 = math.exp %126 : vector<2x128xf32>
    %cst_29 = arith.constant 1.000000e+00 : f32
    %128 = vector.broadcast %cst_29 : f32 to vector<2x128xf32>
    %129 = arith.addf %128, %127 : vector<2x128xf32>
    %130 = arith.divf %128, %129 : vector<2x128xf32>
    %131 = arith.mulf %122, %94 : vector<2x128xf32>
    %132 = arith.mulf %116, %124 : vector<2x128xf32>
    %133 = arith.addf %131, %132 : vector<2x128xf32>
    %134 = math.tanh %133 : vector<2x128xf32>
    %135 = arith.mulf %130, %134 : vector<2x128xf32>
    %136 = vector.broadcast %107 : vector<2x1xf32> to vector<2x128xf32>
    %137 = arith.mulf %136, %133 : vector<2x128xf32>
    %cst_30 = arith.constant 1.000000e+00 : f32
    %138 = vector.broadcast %cst_30 : f32 to vector<2x1xf32>
    %139 = arith.subf %138, %107 : vector<2x1xf32>
    %140 = vector.broadcast %139 : vector<2x1xf32> to vector<2x128xf32>
    %141 = arith.mulf %140, %94 : vector<2x128xf32>
    %142 = arith.addf %137, %141 : vector<2x128xf32>
    %143 = vector.broadcast %107 : vector<2x1xf32> to vector<2x128xf32>
    %144 = arith.mulf %143, %135 : vector<2x128xf32>
    %cst_31 = arith.constant 1.000000e+00 : f32
    %145 = vector.broadcast %cst_31 : f32 to vector<2x1xf32>
    %146 = arith.subf %145, %107 : vector<2x1xf32>
    %147 = vector.broadcast %146 : vector<2x1xf32> to vector<2x128xf32>
    %148 = arith.mulf %147, %101 : vector<2x128xf32>
    %149 = arith.addf %144, %148 : vector<2x128xf32>
    %150 = vector.broadcast %107 : vector<2x1xf32> to vector<2x128xf32>
    %151 = arith.mulf %150, %135 : vector<2x128xf32>
    %152 = arith.truncf %151 : vector<2x128xf32> to vector<2x128xbf16>
    %c4 = arith.constant 4 : index
    %c0_32 = arith.constant 0 : index
    %153 = vector.load %arg6[%c4, %c0_32] : memref<16x128xbf16, #tpu.memory_space<vmem>>, vector<2x128xbf16>
    tpu.vector_store %arg6[%c4, %c0_32], %152 {strides = array<i32>} : memref<16x128xbf16, #tpu.memory_space<vmem>>, vector<2x128xbf16>,
    %154 = vector.extract_strided_slice %5 {offsets = [6, 0], sizes = [2, 512], strides = [1, 1]} : vector<16x512xf32> to vector<2x512xf32>
    %155 = vector.extract_strided_slice %9 {offsets = [6, 0], sizes = [2, 1], strides = [1, 1]} : vector<16x1xf32> to vector<2x1xf32>
    %156 = arith.truncf %149 : vector<2x128xf32> to vector<2x128xbf16>
    %cst_33 = arith.constant dense<0.000000e+00> : vector<2x512xf32>
    %157 = tpu.matmul %156, %6, %cst_33 {dimension_numbers = #tpu.dot_dimension_numbers<[1], [0], [0], [1], [0, 0, 1, 1], [], []>} : vector<2x128xbf16>, vector<128x512xbf16>, vector<2x512xf32> -> vector<2x512xf32>
    %158 = arith.addf %154, %157 : vector<2x512xf32>
    %159 = vector.extract_strided_slice %158 {offsets = [0, 0], sizes = [2, 128], strides = [1, 1]} : vector<2x512xf32> to vector<2x128xf32>
    %160 = arith.negf %159 : vector<2x128xf32>
    %161 = math.exp %160 : vector<2x128xf32>
    %cst_34 = arith.constant 1.000000e+00 : f32
    %162 = vector.broadcast %cst_34 : f32 to vector<2x128xf32>
    %163 = arith.addf %162, %161 : vector<2x128xf32>
    %164 = arith.divf %162, %163 : vector<2x128xf32>
    %165 = vector.extract_strided_slice %158 {offsets = [0, 128], sizes = [2, 128], strides = [1, 1]} : vector<2x512xf32> to vector<2x128xf32>
    %166 = arith.negf %165 : vector<2x128xf32>
    %167 = math.exp %166 : vector<2x128xf32>
    %cst_35 = arith.constant 1.000000e+00 : f32
    %168 = vector.broadcast %cst_35 : f32 to vector<2x128xf32>
    %169 = arith.addf %168, %167 : vector<2x128xf32>
    %170 = arith.divf %168, %169 : vector<2x128xf32>
    %171 = vector.extract_strided_slice %158 {offsets = [0, 256], sizes = [2, 128], strides = [1, 1]} : vector<2x512xf32> to vector<2x128xf32>
    %172 = math.tanh %171 : vector<2x128xf32>
    %173 = vector.extract_strided_slice %158 {offsets = [0, 384], sizes = [2, 128], strides = [1, 1]} : vector<2x512xf32> to vector<2x128xf32>
    %174 = arith.negf %173 : vector<2x128xf32>
    %175 = math.exp %174 : vector<2x128xf32>
    %cst_36 = arith.constant 1.000000e+00 : f32
    %176 = vector.broadcast %cst_36 : f32 to vector<2x128xf32>
    %177 = arith.addf %176, %175 : vector<2x128xf32>
    %178 = arith.divf %176, %177 : vector<2x128xf32>
    %179 = arith.mulf %170, %142 : vector<2x128xf32>
    %180 = arith.mulf %164, %172 : vector<2x128xf32>
    %181 = arith.addf %179, %180 : vector<2x128xf32>
    %182 = math.tanh %181 : vector<2x128xf32>
    %183 = arith.mulf %178, %182 : vector<2x128xf32>
    %184 = vector.broadcast %155 : vector<2x1xf32> to vector<2x128xf32>
    %185 = arith.mulf %184, %181 : vector<2x128xf32>
    %cst_37 = arith.constant 1.000000e+00 : f32
    %186 = vector.broadcast %cst_37 : f32 to vector<2x1xf32>
    %187 = arith.subf %186, %155 : vector<2x1xf32>
    %188 = vector.broadcast %187 : vector<2x1xf32> to vector<2x128xf32>
    %189 = arith.mulf %188, %142 : vector<2x128xf32>
    %190 = arith.addf %185, %189 : vector<2x128xf32>
    %191 = vector.broadcast %155 : vector<2x1xf32> to vector<2x128xf32>
    %192 = arith.mulf %191, %183 : vector<2x128xf32>
    %cst_38 = arith.constant 1.000000e+00 : f32
    %193 = vector.broadcast %cst_38 : f32 to vector<2x1xf32>
    %194 = arith.subf %193, %155 : vector<2x1xf32>
    %195 = vector.broadcast %194 : vector<2x1xf32> to vector<2x128xf32>
    %196 = arith.mulf %195, %149 : vector<2x128xf32>
    %197 = arith.addf %192, %196 : vector<2x128xf32>
    %198 = vector.broadcast %155 : vector<2x1xf32> to vector<2x128xf32>
    %199 = arith.mulf %198, %183 : vector<2x128xf32>
    %200 = arith.truncf %199 : vector<2x128xf32> to vector<2x128xbf16>
    %c6 = arith.constant 6 : index
    %c0_39 = arith.constant 0 : index
    %201 = vector.load %arg6[%c6, %c0_39] : memref<16x128xbf16, #tpu.memory_space<vmem>>, vector<2x128xbf16>
    tpu.vector_store %arg6[%c6, %c0_39], %200 {strides = array<i32>} : memref<16x128xbf16, #tpu.memory_space<vmem>>, vector<2x128xbf16>,
    %202 = vector.extract_strided_slice %5 {offsets = [8, 0], sizes = [2, 512], strides = [1, 1]} : vector<16x512xf32> to vector<2x512xf32>
    %203 = vector.extract_strided_slice %9 {offsets = [8, 0], sizes = [2, 1], strides = [1, 1]} : vector<16x1xf32> to vector<2x1xf32>
    %204 = arith.truncf %197 : vector<2x128xf32> to vector<2x128xbf16>
    %cst_40 = arith.constant dense<0.000000e+00> : vector<2x512xf32>
    %205 = tpu.matmul %204, %6, %cst_40 {dimension_numbers = #tpu.dot_dimension_numbers<[1], [0], [0], [1], [0, 0, 1, 1], [], []>} : vector<2x128xbf16>, vector<128x512xbf16>, vector<2x512xf32> -> vector<2x512xf32>
    %206 = arith.addf %202, %205 : vector<2x512xf32>
    %207 = vector.extract_strided_slice %206 {offsets = [0, 0], sizes = [2, 128], strides = [1, 1]} : vector<2x512xf32> to vector<2x128xf32>
    %208 = arith.negf %207 : vector<2x128xf32>
    %209 = math.exp %208 : vector<2x128xf32>
    %cst_41 = arith.constant 1.000000e+00 : f32
    %210 = vector.broadcast %cst_41 : f32 to vector<2x128xf32>
    %211 = arith.addf %210, %209 : vector<2x128xf32>
    %212 = arith.divf %210, %211 : vector<2x128xf32>
    %213 = vector.extract_strided_slice %206 {offsets = [0, 128], sizes = [2, 128], strides = [1, 1]} : vector<2x512xf32> to vector<2x128xf32>
    %214 = arith.negf %213 : vector<2x128xf32>
    %215 = math.exp %214 : vector<2x128xf32>
    %cst_42 = arith.constant 1.000000e+00 : f32
    %216 = vector.broadcast %cst_42 : f32 to vector<2x128xf32>
    %217 = arith.addf %216, %215 : vector<2x128xf32>
    %218 = arith.divf %216, %217 : vector<2x128xf32>
    %219 = vector.extract_strided_slice %206 {offsets = [0, 256], sizes = [2, 128], strides = [1, 1]} : vector<2x512xf32> to vector<2x128xf32>
    %220 = math.tanh %219 : vector<2x128xf32>
    %221 = vector.extract_strided_slice %206 {offsets = [0, 384], sizes = [2, 128], strides = [1, 1]} : vector<2x512xf32> to vector<2x128xf32>
    %222 = arith.negf %221 : vector<2x128xf32>
    %223 = math.exp %222 : vector<2x128xf32>
    %cst_43 = arith.constant 1.000000e+00 : f32
    %224 = vector.broadcast %cst_43 : f32 to vector<2x128xf32>
    %225 = arith.addf %224, %223 : vector<2x128xf32>
    %226 = arith.divf %224, %225 : vector<2x128xf32>
    %227 = arith.mulf %218, %190 : vector<2x128xf32>
    %228 = arith.mulf %212, %220 : vector<2x128xf32>
    %229 = arith.addf %227, %228 : vector<2x128xf32>
    %230 = math.tanh %229 : vector<2x128xf32>
    %231 = arith.mulf %226, %230 : vector<2x128xf32>
    %232 = vector.broadcast %203 : vector<2x1xf32> to vector<2x128xf32>
    %233 = arith.mulf %232, %229 : vector<2x128xf32>
    %cst_44 = arith.constant 1.000000e+00 : f32
    %234 = vector.broadcast %cst_44 : f32 to vector<2x1xf32>
    %235 = arith.subf %234, %203 : vector<2x1xf32>
    %236 = vector.broadcast %235 : vector<2x1xf32> to vector<2x128xf32>
    %237 = arith.mulf %236, %190 : vector<2x128xf32>
    %238 = arith.addf %233, %237 : vector<2x128xf32>
    %239 = vector.broadcast %203 : vector<2x1xf32> to vector<2x128xf32>
    %240 = arith.mulf %239, %231 : vector<2x128xf32>
    %cst_45 = arith.constant 1.000000e+00 : f32
    %241 = vector.broadcast %cst_45 : f32 to vector<2x1xf32>
    %242 = arith.subf %241, %203 : vector<2x1xf32>
    %243 = vector.broadcast %242 : vector<2x1xf32> to vector<2x128xf32>
    %244 = arith.mulf %243, %197 : vector<2x128xf32>
    %245 = arith.addf %240, %244 : vector<2x128xf32>
    %246 = vector.broadcast %203 : vector<2x1xf32> to vector<2x128xf32>
    %247 = arith.mulf %246, %231 : vector<2x128xf32>
    %248 = arith.truncf %247 : vector<2x128xf32> to vector<2x128xbf16>
    %c8 = arith.constant 8 : index
    %c0_46 = arith.constant 0 : index
    %249 = vector.load %arg6[%c8, %c0_46] : memref<16x128xbf16, #tpu.memory_space<vmem>>, vector<2x128xbf16>
    tpu.vector_store %arg6[%c8, %c0_46], %248 {strides = array<i32>} : memref<16x128xbf16, #tpu.memory_space<vmem>>, vector<2x128xbf16>,
    %250 = vector.extract_strided_slice %5 {offsets = [10, 0], sizes = [2, 512], strides = [1, 1]} : vector<16x512xf32> to vector<2x512xf32>
    %251 = vector.extract_strided_slice %9 {offsets = [10, 0], sizes = [2, 1], strides = [1, 1]} : vector<16x1xf32> to vector<2x1xf32>
    %252 = arith.truncf %245 : vector<2x128xf32> to vector<2x128xbf16>
    %cst_47 = arith.constant dense<0.000000e+00> : vector<2x512xf32>
    %253 = tpu.matmul %252, %6, %cst_47 {dimension_numbers = #tpu.dot_dimension_numbers<[1], [0], [0], [1], [0, 0, 1, 1], [], []>} : vector<2x128xbf16>, vector<128x512xbf16>, vector<2x512xf32> -> vector<2x512xf32>
    %254 = arith.addf %250, %253 : vector<2x512xf32>
    %255 = vector.extract_strided_slice %254 {offsets = [0, 0], sizes = [2, 128], strides = [1, 1]} : vector<2x512xf32> to vector<2x128xf32>
    %256 = arith.negf %255 : vector<2x128xf32>
    %257 = math.exp %256 : vector<2x128xf32>
    %cst_48 = arith.constant 1.000000e+00 : f32
    %258 = vector.broadcast %cst_48 : f32 to vector<2x128xf32>
    %259 = arith.addf %258, %257 : vector<2x128xf32>
    %260 = arith.divf %258, %259 : vector<2x128xf32>
    %261 = vector.extract_strided_slice %254 {offsets = [0, 128], sizes = [2, 128], strides = [1, 1]} : vector<2x512xf32> to vector<2x128xf32>
    %262 = arith.negf %261 : vector<2x128xf32>
    %263 = math.exp %262 : vector<2x128xf32>
    %cst_49 = arith.constant 1.000000e+00 : f32
    %264 = vector.broadcast %cst_49 : f32 to vector<2x128xf32>
    %265 = arith.addf %264, %263 : vector<2x128xf32>
    %266 = arith.divf %264, %265 : vector<2x128xf32>
    %267 = vector.extract_strided_slice %254 {offsets = [0, 256], sizes = [2, 128], strides = [1, 1]} : vector<2x512xf32> to vector<2x128xf32>
    %268 = math.tanh %267 : vector<2x128xf32>
    %269 = vector.extract_strided_slice %254 {offsets = [0, 384], sizes = [2, 128], strides = [1, 1]} : vector<2x512xf32> to vector<2x128xf32>
    %270 = arith.negf %269 : vector<2x128xf32>
    %271 = math.exp %270 : vector<2x128xf32>
    %cst_50 = arith.constant 1.000000e+00 : f32
    %272 = vector.broadcast %cst_50 : f32 to vector<2x128xf32>
    %273 = arith.addf %272, %271 : vector<2x128xf32>
    %274 = arith.divf %272, %273 : vector<2x128xf32>
    %275 = arith.mulf %266, %238 : vector<2x128xf32>
    %276 = arith.mulf %260, %268 : vector<2x128xf32>
    %277 = arith.addf %275, %276 : vector<2x128xf32>
    %278 = math.tanh %277 : vector<2x128xf32>
    %279 = arith.mulf %274, %278 : vector<2x128xf32>
    %280 = vector.broadcast %251 : vector<2x1xf32> to vector<2x128xf32>
    %281 = arith.mulf %280, %277 : vector<2x128xf32>
    %cst_51 = arith.constant 1.000000e+00 : f32
    %282 = vector.broadcast %cst_51 : f32 to vector<2x1xf32>
    %283 = arith.subf %282, %251 : vector<2x1xf32>
    %284 = vector.broadcast %283 : vector<2x1xf32> to vector<2x128xf32>
    %285 = arith.mulf %284, %238 : vector<2x128xf32>
    %286 = arith.addf %281, %285 : vector<2x128xf32>
    %287 = vector.broadcast %251 : vector<2x1xf32> to vector<2x128xf32>
    %288 = arith.mulf %287, %279 : vector<2x128xf32>
    %cst_52 = arith.constant 1.000000e+00 : f32
    %289 = vector.broadcast %cst_52 : f32 to vector<2x1xf32>
    %290 = arith.subf %289, %251 : vector<2x1xf32>
    %291 = vector.broadcast %290 : vector<2x1xf32> to vector<2x128xf32>
    %292 = arith.mulf %291, %245 : vector<2x128xf32>
    %293 = arith.addf %288, %292 : vector<2x128xf32>
    %294 = vector.broadcast %251 : vector<2x1xf32> to vector<2x128xf32>
    %295 = arith.mulf %294, %279 : vector<2x128xf32>
    %296 = arith.truncf %295 : vector<2x128xf32> to vector<2x128xbf16>
    %c10 = arith.constant 10 : index
    %c0_53 = arith.constant 0 : index
    %297 = vector.load %arg6[%c10, %c0_53] : memref<16x128xbf16, #tpu.memory_space<vmem>>, vector<2x128xbf16>
    tpu.vector_store %arg6[%c10, %c0_53], %296 {strides = array<i32>} : memref<16x128xbf16, #tpu.memory_space<vmem>>, vector<2x128xbf16>,
    %298 = vector.extract_strided_slice %5 {offsets = [12, 0], sizes = [2, 512], strides = [1, 1]} : vector<16x512xf32> to vector<2x512xf32>
    %299 = vector.extract_strided_slice %9 {offsets = [12, 0], sizes = [2, 1], strides = [1, 1]} : vector<16x1xf32> to vector<2x1xf32>
    %300 = arith.truncf %293 : vector<2x128xf32> to vector<2x128xbf16>
    %cst_54 = arith.constant dense<0.000000e+00> : vector<2x512xf32>
    %301 = tpu.matmul %300, %6, %cst_54 {dimension_numbers = #tpu.dot_dimension_numbers<[1], [0], [0], [1], [0, 0, 1, 1], [], []>} : vector<2x128xbf16>, vector<128x512xbf16>, vector<2x512xf32> -> vector<2x512xf32>
    %302 = arith.addf %298, %301 : vector<2x512xf32>
    %303 = vector.extract_strided_slice %302 {offsets = [0, 0], sizes = [2, 128], strides = [1, 1]} : vector<2x512xf32> to vector<2x128xf32>
    %304 = arith.negf %303 : vector<2x128xf32>
    %305 = math.exp %304 : vector<2x128xf32>
    %cst_55 = arith.constant 1.000000e+00 : f32
    %306 = vector.broadcast %cst_55 : f32 to vector<2x128xf32>
    %307 = arith.addf %306, %305 : vector<2x128xf32>
    %308 = arith.divf %306, %307 : vector<2x128xf32>
    %309 = vector.extract_strided_slice %302 {offsets = [0, 128], sizes = [2, 128], strides = [1, 1]} : vector<2x512xf32> to vector<2x128xf32>
    %310 = arith.negf %309 : vector<2x128xf32>
    %311 = math.exp %310 : vector<2x128xf32>
    %cst_56 = arith.constant 1.000000e+00 : f32
    %312 = vector.broadcast %cst_56 : f32 to vector<2x128xf32>
    %313 = arith.addf %312, %311 : vector<2x128xf32>
    %314 = arith.divf %312, %313 : vector<2x128xf32>
    %315 = vector.extract_strided_slice %302 {offsets = [0, 256], sizes = [2, 128], strides = [1, 1]} : vector<2x512xf32> to vector<2x128xf32>
    %316 = math.tanh %315 : vector<2x128xf32>
    %317 = vector.extract_strided_slice %302 {offsets = [0, 384], sizes = [2, 128], strides = [1, 1]} : vector<2x512xf32> to vector<2x128xf32>
    %318 = arith.negf %317 : vector<2x128xf32>
    %319 = math.exp %318 : vector<2x128xf32>
    %cst_57 = arith.constant 1.000000e+00 : f32
    %320 = vector.broadcast %cst_57 : f32 to vector<2x128xf32>
    %321 = arith.addf %320, %319 : vector<2x128xf32>
    %322 = arith.divf %320, %321 : vector<2x128xf32>
    %323 = arith.mulf %314, %286 : vector<2x128xf32>
    %324 = arith.mulf %308, %316 : vector<2x128xf32>
    %325 = arith.addf %323, %324 : vector<2x128xf32>
    %326 = math.tanh %325 : vector<2x128xf32>
    %327 = arith.mulf %322, %326 : vector<2x128xf32>
    %328 = vector.broadcast %299 : vector<2x1xf32> to vector<2x128xf32>
    %329 = arith.mulf %328, %325 : vector<2x128xf32>
    %cst_58 = arith.constant 1.000000e+00 : f32
    %330 = vector.broadcast %cst_58 : f32 to vector<2x1xf32>
    %331 = arith.subf %330, %299 : vector<2x1xf32>
    %332 = vector.broadcast %331 : vector<2x1xf32> to vector<2x128xf32>
    %333 = arith.mulf %332, %286 : vector<2x128xf32>
    %334 = arith.addf %329, %333 : vector<2x128xf32>
    %335 = vector.broadcast %299 : vector<2x1xf32> to vector<2x128xf32>
    %336 = arith.mulf %335, %327 : vector<2x128xf32>
    %cst_59 = arith.constant 1.000000e+00 : f32
    %337 = vector.broadcast %cst_59 : f32 to vector<2x1xf32>
    %338 = arith.subf %337, %299 : vector<2x1xf32>
    %339 = vector.broadcast %338 : vector<2x1xf32> to vector<2x128xf32>
    %340 = arith.mulf %339, %293 : vector<2x128xf32>
    %341 = arith.addf %336, %340 : vector<2x128xf32>
    %342 = vector.broadcast %299 : vector<2x1xf32> to vector<2x128xf32>
    %343 = arith.mulf %342, %327 : vector<2x128xf32>
    %344 = arith.truncf %343 : vector<2x128xf32> to vector<2x128xbf16>
    %c12 = arith.constant 12 : index
    %c0_60 = arith.constant 0 : index
    %345 = vector.load %arg6[%c12, %c0_60] : memref<16x128xbf16, #tpu.memory_space<vmem>>, vector<2x128xbf16>
    tpu.vector_store %arg6[%c12, %c0_60], %344 {strides = array<i32>} : memref<16x128xbf16, #tpu.memory_space<vmem>>, vector<2x128xbf16>,
    %346 = vector.extract_strided_slice %5 {offsets = [14, 0], sizes = [2, 512], strides = [1, 1]} : vector<16x512xf32> to vector<2x512xf32>
    %347 = vector.extract_strided_slice %9 {offsets = [14, 0], sizes = [2, 1], strides = [1, 1]} : vector<16x1xf32> to vector<2x1xf32>
    %348 = arith.truncf %341 : vector<2x128xf32> to vector<2x128xbf16>
    %cst_61 = arith.constant dense<0.000000e+00> : vector<2x512xf32>
    %349 = tpu.matmul %348, %6, %cst_61 {dimension_numbers = #tpu.dot_dimension_numbers<[1], [0], [0], [1], [0, 0, 1, 1], [], []>} : vector<2x128xbf16>, vector<128x512xbf16>, vector<2x512xf32> -> vector<2x512xf32>
    %350 = arith.addf %346, %349 : vector<2x512xf32>
    %351 = vector.extract_strided_slice %350 {offsets = [0, 0], sizes = [2, 128], strides = [1, 1]} : vector<2x512xf32> to vector<2x128xf32>
    %352 = arith.negf %351 : vector<2x128xf32>
    %353 = math.exp %352 : vector<2x128xf32>
    %cst_62 = arith.constant 1.000000e+00 : f32
    %354 = vector.broadcast %cst_62 : f32 to vector<2x128xf32>
    %355 = arith.addf %354, %353 : vector<2x128xf32>
    %356 = arith.divf %354, %355 : vector<2x128xf32>
    %357 = vector.extract_strided_slice %350 {offsets = [0, 128], sizes = [2, 128], strides = [1, 1]} : vector<2x512xf32> to vector<2x128xf32>
    %358 = arith.negf %357 : vector<2x128xf32>
    %359 = math.exp %358 : vector<2x128xf32>
    %cst_63 = arith.constant 1.000000e+00 : f32
    %360 = vector.broadcast %cst_63 : f32 to vector<2x128xf32>
    %361 = arith.addf %360, %359 : vector<2x128xf32>
    %362 = arith.divf %360, %361 : vector<2x128xf32>
    %363 = vector.extract_strided_slice %350 {offsets = [0, 256], sizes = [2, 128], strides = [1, 1]} : vector<2x512xf32> to vector<2x128xf32>
    %364 = math.tanh %363 : vector<2x128xf32>
    %365 = vector.extract_strided_slice %350 {offsets = [0, 384], sizes = [2, 128], strides = [1, 1]} : vector<2x512xf32> to vector<2x128xf32>
    %366 = arith.negf %365 : vector<2x128xf32>
    %367 = math.exp %366 : vector<2x128xf32>
    %cst_64 = arith.constant 1.000000e+00 : f32
    %368 = vector.broadcast %cst_64 : f32 to vector<2x128xf32>
    %369 = arith.addf %368, %367 : vector<2x128xf32>
    %370 = arith.divf %368, %369 : vector<2x128xf32>
    %371 = arith.mulf %362, %334 : vector<2x128xf32>
    %372 = arith.mulf %356, %364 : vector<2x128xf32>
    %373 = arith.addf %371, %372 : vector<2x128xf32>
    %374 = math.tanh %373 : vector<2x128xf32>
    %375 = arith.mulf %370, %374 : vector<2x128xf32>
    %376 = vector.broadcast %347 : vector<2x1xf32> to vector<2x128xf32>
    %377 = arith.mulf %376, %375 : vector<2x128xf32>
    %378 = arith.truncf %377 : vector<2x128xf32> to vector<2x128xbf16>
    %c14 = arith.constant 14 : index
    %c0_65 = arith.constant 0 : index
    %379 = vector.load %arg6[%c14, %c0_65] : memref<16x128xbf16, #tpu.memory_space<vmem>>, vector<2x128xbf16>
    tpu.vector_store %arg6[%c14, %c0_65], %378 {strides = array<i32>} : memref<16x128xbf16, #tpu.memory_space<vmem>>, vector<2x128xbf16>,
    return
  }
  func.func @transform_0(%arg0: i32) -> (i32, i32) {
    %c0_i32 = arith.constant 0 : i32
    %c0_i32_0 = arith.constant 0 : i32
    return %arg0, %c0_i32 : i32, i32
  }
  func.func @transform_1(%arg0: i32) -> (i32, i32) {
    %c0_i32 = arith.constant 0 : i32
    %c0_i32_0 = arith.constant 0 : i32
    return %arg0, %c0_i32 : i32, i32
  }
  func.func @transform_2(%arg0: i32) -> (i32, i32) {
    %c0_i32 = arith.constant 0 : i32
    %c0_i32_0 = arith.constant 0 : i32
    %c0_i32_1 = arith.constant 0 : i32
    return %c0_i32, %c0_i32_0 : i32, i32
  }
  func.func @transform_3(%arg0: i32) -> (i32, i32) {
    %c0_i32 = arith.constant 0 : i32
    %c0_i32_0 = arith.constant 0 : i32
    %c0_i32_1 = arith.constant 0 : i32
    return %c0_i32, %c0_i32_0 : i32, i32
  }
  func.func @transform_4(%arg0: i32) -> (i32, i32) {
    %c0_i32 = arith.constant 0 : i32
    %c0_i32_0 = arith.constant 0 : i32
    %c0_i32_1 = arith.constant 0 : i32
    return %c0_i32, %c0_i32_0 : i32, i32
  }
  func.func @transform_5(%arg0: i32) -> (i32, i32) {
    %c0_i32 = arith.constant 0 : i32
    %c0_i32_0 = arith.constant 0 : i32
    return %arg0, %c0_i32 : i32, i32
  }
}

</mosaic_0001>

<bundles_post_ra>
// kernel: tpu_custom_call.1
= control target key start
LH: loop header
LB: loop body
LE: loop exit
PB: predicated region body
PF: predicated region fallthrough
CT: control target
= control target key end

     0   :  { %10 = vsyncpa [#allocation4], 0  ;;  %s2821_s0 = inlined_call_operand.vmem [shape: bf16[16,128], index: 0, kind: input, shape index: {}]   ;;  %s2822_s1 = inlined_call_operand.vmem [shape: f32[16,1], index: 1, kind: input, shape index: {}]   ;;  %s2823_s2 = inlined_call_operand.hbm [shape: bf16[128,512], index: 2, kind: input, shape index: {}]   ;;  %s2824_s3 = inlined_call_operand.hbm [shape: bf16[128,512], index: 3, kind: input, shape index: {}]   ;;  %s2825_s4 = inlined_call_operand.vmem [shape: f32[1,512], index: 4, kind: input, shape index: {}]   ;;  %s2826_s5 = inlined_call_operand.hbm [shape: bf16[16,128], index: 5, kind: output, shape index: {}]  }
   0x1   :  { %11 = vsyncpa [#allocation7], 0 }
   0x2   :  { %12 = vsyncpa [#allocation5], 0  ;;  %s21_s20 = sshll.u32 %s2823_s2, 4  ;;  %s2264_s21 = smov [#allocation3]   ;;  %s22_s20 = int_to_ptr.hbm [resolvable:$true] %s21_s20 }
   0x3   :  { %s23_s22 = sshll.u32 %s2264_s21, 4  ;;  %s34_s25 = sshll.u32 %s2824_s3, 4  ;;  %s24_s22 = int_to_ptr.vmem [resolvable:$true] %s23_s22  ;;  %s35_s25 = int_to_ptr.hbm [resolvable:$true] %s34_s25 }
   0x4   :  { %s2265_s26 = smov 256   ;;  %s2266_s27 = smov 16  }
   0x5   :  { %29 = dma.hbm_to_vmem [thread:$0]  %s22_s20, 4096, %s24_s22, [#allocation4], %s2265_s26, %s2265_s26, %s2266_s27  }
   0x6   :  { %s2267_s28 = smov [#allocation6]  }
   0x7   :  { %s36_s29 = sshll.u32 %s2267_s28, 4  ;;  %s37_s29 = int_to_ptr.vmem [resolvable:$true] %s36_s29 }
   0x8   :  { %42 = dma.hbm_to_vmem [thread:$0]  %s35_s25, 4096, %s37_s29, [#allocation7], %s2265_s26, %s2265_s26, %s2266_s27  }
   0x9   :  { %2258 = dma.done.wait [#allocation4], 4096  }
   0xa   :  { %2259 = vsyncadd [#allocation4], 4294963200 }
   0xb   :  { %2260 = dma.done.wait [#allocation7], 4096  }
   0xc   :  { %2261 = vsyncadd [#allocation7], 4294963200  ;;  %v1817_v0 = vld [vmem:[#allocation3 + $0xe0] sm:$0xf]  ;;  %v2014_v1 = vld [vmem:[#allocation3 + $0xec] sm:$0xf0] }
   0xd   :  { %v2012_v2 = vld [vmem:[#allocation3 + $0xe4] sm:$0xf]  ;;  %v1818_v3 = vor.u32 %v2014_v1, %v1817_v0  ;;  %v1819_v4 = vld [vmem:[#allocation3 + $0xf0] sm:$0xf0]  ;;  %v2013_v5 = vld [vmem:[#allocation3 + $0xec] sm:$0xf] }
   0xe   :  { %v1827_v6 = vld [vmem:[#allocation3 + $0xf8] sm:$0xf0]  ;;  %v1822_v7 = vor.u32 %v2012_v2, %v1819_v4  ;;  %v1825_v9 = vld [vmem:[#allocation3 + $0xe8] sm:$0xf]  ;;  %v2015_v10 = vld [vmem:[#allocation3 + $0xf4] sm:$0xf0] }
   0xf   :  { %v1830_v8 = vor.u32 %v2013_v5, %v1827_v6  ;;  %v1801_v11 = vld [vmem:[#allocation3 + $0xc0] sm:$0xf]  ;;  %264 = vmatpush.bf16.msra.mxu0 %v1818_v3  ;;  %v1826_v12 = vor.u32 %v2015_v10, %v1825_v9  ;;  %v2010_v13 = vld [vmem:[#allocation3 + $0xcc] sm:$0xf0]  ;;  %v2008_v14 = vld [vmem:[#allocation3 + $0xc4] sm:$0xf] }
  0x10   :  { %v1803_v15 = vld [vmem:[#allocation3 + $0xd0] sm:$0xf0]  ;;  %278 = vmatpush.bf16.msra.mxu1 %v1822_v7  ;;  %v1802_v16 = vor.u32 %v2010_v13, %v1801_v11  ;;  %v2009_v18 = vld [vmem:[#allocation3 + $0xcc] sm:$0xf]  ;;  %v1811_v19 = vld [vmem:[#allocation3 + $0xd8] sm:$0xf0] }
  0x11   :  { %306 = vmatpush.bf16.msra.mxu3 %v1830_v8  ;;  %v1806_v17 = vor.u32 %v2008_v14, %v1803_v15  ;;  %v1809_v20 = vld [vmem:[#allocation3 + $0xc8] sm:$0xf]  ;;  %292 = vmatpush.bf16.msra.mxu2 %v1826_v12  ;;  %v1814_v21 = vor.u32 %v2009_v18, %v1811_v19  ;;  %v2011_v22 = vld [vmem:[#allocation3 + $0xd4] sm:$0xf0]  ;;  %v1785_v23 = vld [vmem:[#allocation3 + $0xa0] sm:$0xf] }
  0x12   :  { %v2006_v24 = vld [vmem:[#allocation3 + $0xac] sm:$0xf0]  ;;  %v1810_v25 = vor.u32 %v2011_v22, %v1809_v20  ;;  %v2004_v26 = vld [vmem:[#allocation3 + $0xa4] sm:$0xf]  ;;  %v1787_v27 = vld [vmem:[#allocation3 + $0xb0] sm:$0xf0] }
  0x13   :  { %v2005_v28 = vld [vmem:[#allocation3 + $0xac] sm:$0xf]  ;;  %265 = vmatpush.bf16.msra.mxu0 %v1802_v16  ;;  %v1786_v29 = vor.u32 %v2006_v24, %v1785_v23  ;;  %v1795_v30 = vld [vmem:[#allocation3 + $0xb8] sm:$0xf0]  ;;  %v1793_v31 = vld [vmem:[#allocation3 + $0xa8] sm:$0xf]  ;;  %v1790_v33 = vor.u32 %v2004_v26, %v1787_v27 }
  0x14   :  { %v2007_v32 = vld [vmem:[#allocation3 + $0xb4] sm:$0xf0]  ;;  %279 = vmatpush.bf16.msra.mxu1 %v1806_v17  ;;  %v1798_v34 = vor.u32 %v2005_v28, %v1795_v30  ;;  %v1769_v35 = vld [vmem:[#allocation3 + $0x80] sm:$0xf]  ;;  %v2002_v36 = vld [vmem:[#allocation3 + $0x8c] sm:$0xf0] }
  0x15   :  { %307 = vmatpush.bf16.msra.mxu3 %v1814_v21  ;;  %v2000_v37 = vld [vmem:[#allocation3 + $0x84] sm:$0xf]  ;;  %293 = vmatpush.bf16.msra.mxu2 %v1810_v25  ;;  %v1794_v38 = vor.u32 %v2007_v32, %v1793_v31  ;;  %v1771_v39 = vld [vmem:[#allocation3 + $0x90] sm:$0xf0]  ;;  %v2001_v40 = vld [vmem:[#allocation3 + $0x8c] sm:$0xf]  ;;  %v1770_v44 = vor.u32 %v2002_v36, %v1769_v35 }
  0x16   :  { %v1779_v41 = vld [vmem:[#allocation3 + $0x98] sm:$0xf0]  ;;  %v1777_v42 = vld [vmem:[#allocation3 + $0x88] sm:$0xf]  ;;  %v2003_v43 = vld [vmem:[#allocation3 + $0x94] sm:$0xf0]  ;;  %v1774_v45 = vor.u32 %v2000_v37, %v1771_v39 }
  0x17   :  { %266 = vmatpush.bf16.msra.mxu0 %v1786_v29  ;;  %v1782_v46 = vor.u32 %v2001_v40, %v1779_v41  ;;  %v1753_v47 = vld [vmem:[#allocation3 + $0x60] sm:$0xf]  ;;  %v1998_v48 = vld [vmem:[#allocation3 + $0x6c] sm:$0xf0]  ;;  %v1996_v49 = vld [vmem:[#allocation3 + $0x64] sm:$0xf]  ;;  %v1778_v50 = vor.u32 %v2003_v43, %v1777_v42 }
  0x18   :  { %280 = vmatpush.bf16.msra.mxu1 %v1790_v33  ;;  %v1755_v51 = vld [vmem:[#allocation3 + $0x70] sm:$0xf0]  ;;  %v1997_v52 = vld [vmem:[#allocation3 + $0x6c] sm:$0xf]  ;;  %v1763_v53 = vld [vmem:[#allocation3 + $0x78] sm:$0xf0]  ;;  %v1754_v56 = vor.u32 %v1998_v48, %v1753_v47 }
  0x19   :  { %308 = vmatpush.bf16.msra.mxu3 %v1798_v34  ;;  %294 = vmatpush.bf16.msra.mxu2 %v1794_v38  ;;  %v1761_v54 = vld [vmem:[#allocation3 + $0x68] sm:$0xf]  ;;  %v1999_v55 = vld [vmem:[#allocation3 + $0x74] sm:$0xf0]  ;;  %v1758_v57 = vor.u32 %v1996_v49, %v1755_v51  ;;  %v1766_v58 = vor.u32 %v1997_v52, %v1763_v53  ;;  %v1737_v59 = vld [vmem:[#allocation3 + $0x40] sm:$0xf] }
  0x1a   :  { %v1994_v60 = vld [vmem:[#allocation3 + $0x4c] sm:$0xf0]  ;;  %v1992_v61 = vld [vmem:[#allocation3 + $0x44] sm:$0xf]  ;;  %v1762_v62 = vor.u32 %v1999_v55, %v1761_v54  ;;  %v1739_v63 = vld [vmem:[#allocation3 + $0x50] sm:$0xf0] }
  0x1b   :  { %267 = vmatpush.bf16.msra.mxu0 %v1770_v44  ;;  %v1993_v0 = vld [vmem:[#allocation3 + $0x4c] sm:$0xf]  ;;  %v1747_v1 = vld [vmem:[#allocation3 + $0x58] sm:$0xf0]  ;;  %v1745_v2 = vld [vmem:[#allocation3 + $0x48] sm:$0xf]  ;;  %v1738_v4 = vor.u32 %v1994_v60, %v1737_v59  ;;  %v1742_v5 = vor.u32 %v1992_v61, %v1739_v63 }
  0x1c   :  { %281 = vmatpush.bf16.msra.mxu1 %v1774_v45  ;;  %v1995_v3 = vld [vmem:[#allocation3 + $0x54] sm:$0xf0]  ;;  %v1750_v6 = vor.u32 %v1993_v0, %v1747_v1  ;;  %v1721_v7 = vld [vmem:[#allocation3 + $0x20] sm:$0xf]  ;;  %v1990_v8 = vld [vmem:[#allocation3 + $0x2c] sm:$0xf0] }
  0x1d   :  { %309 = vmatpush.bf16.msra.mxu3 %v1782_v46  ;;  %295 = vmatpush.bf16.msra.mxu2 %v1778_v50  ;;  %v1988_v9 = vld [vmem:[#allocation3 + $0x24] sm:$0xf]  ;;  %v1746_v10 = vor.u32 %v1995_v3, %v1745_v2  ;;  %v1723_v11 = vld [vmem:[#allocation3 + $0x30] sm:$0xf0]  ;;  %v1989_v12 = vld [vmem:[#allocation3 + $0x2c] sm:$0xf]  ;;  %v1722_v16 = vor.u32 %v1990_v8, %v1721_v7 }
  0x1e   :  { %v1731_v13 = vld [vmem:[#allocation3 + $0x38] sm:$0xf0]  ;;  %v1729_v14 = vld [vmem:[#allocation3 + $0x28] sm:$0xf]  ;;  %v1991_v15 = vld [vmem:[#allocation3 + $0x34] sm:$0xf0]  ;;  %v1726_v19 = vor.u32 %v1988_v9, %v1723_v11 }
  0x1f   :  { %268 = vmatpush.bf16.msra.mxu0 %v1754_v56  ;;  %v1705_v17 = vld [vmem:[#allocation3] sm:$0xf]  ;;  %v1986_v18 = vld [vmem:[#allocation3 + $0xc] sm:$0xf0]  ;;  %v1734_v20 = vor.u32 %v1989_v12, %v1731_v13  ;;  %v1984_v21 = vld [vmem:[#allocation3 + $0x4] sm:$0xf]  ;;  %v1730_v24 = vor.u32 %v1991_v15, %v1729_v14 }
  0x20   :  { %282 = vmatpush.bf16.msra.mxu1 %v1758_v57  ;;  %v1707_v22 = vld [vmem:[#allocation3 + $0x10] sm:$0xf0]  ;;  %v1985_v23 = vld [vmem:[#allocation3 + $0xc] sm:$0xf]  ;;  %v1715_v25 = vld [vmem:[#allocation3 + $0x18] sm:$0xf0]  ;;  %v1706_v31 = vor.u32 %v1986_v18, %v1705_v17 }
  0x21   :  { %310 = vmatpush.bf16.msra.mxu3 %v1766_v58  ;;  %296 = vmatpush.bf16.msra.mxu2 %v1762_v62  ;;  %v1713_v26 = vld [vmem:[#allocation3 + $0x8] sm:$0xf]  ;;  %v1987_v27 = vld [vmem:[#allocation3 + $0x14] sm:$0xf0]  ;;  %v1945_v28 = vld [vmem:[#allocation6 + $0xe0] sm:$0xf]  ;;  %v1710_v35 = vor.u32 %v1984_v21, %v1707_v22  ;;  %v1718_v36 = vor.u32 %v1985_v23, %v1715_v25 }
  0x22   :  { %v2046_v29 = vld [vmem:[#allocation6 + $0xec] sm:$0xf0]  ;;  %v2044_v30 = vld [vmem:[#allocation6 + $0xe4] sm:$0xf]  ;;  %v1947_v32 = vld [vmem:[#allocation6 + $0xf0] sm:$0xf0]  ;;  %v1714_v39 = vor.u32 %v1987_v27, %v1713_v26 }
  0x23   :  { %269 = vmatpush.bf16.msra.mxu0 %v1738_v4  ;;  %v2045_v33 = vld [vmem:[#allocation6 + $0xec] sm:$0xf]  ;;  %v1955_v34 = vld [vmem:[#allocation6 + $0xf8] sm:$0xf0]  ;;  %v1953_v37 = vld [vmem:[#allocation6 + $0xe8] sm:$0xf]  ;;  %v2308_v40 = vor.u32 %v2046_v29, %v1945_v28  ;;  %v2310_v42 = vor.u32 %v2044_v30, %v1947_v32 }
  0x24   :  { %283 = vmatpush.bf16.msra.mxu1 %v1742_v5  ;;  %v2047_v38 = vld [vmem:[#allocation6 + $0xf4] sm:$0xf0]  ;;  %v1929_v41 = vld [vmem:[#allocation6 + $0xc0] sm:$0xf]  ;;  %v2312_v43 = vor.u32 %v2045_v33, %v1955_v34  ;;  %v2042_v44 = vld [vmem:[#allocation6 + $0xcc] sm:$0xf0] }
  0x25   :  { %311 = vmatpush.bf16.msra.mxu3 %v1750_v6  ;;  %297 = vmatpush.bf16.msra.mxu2 %v1746_v10  ;;  %v2040_v45 = vld [vmem:[#allocation6 + $0xc4] sm:$0xf]  ;;  %v1931_v46 = vld [vmem:[#allocation6 + $0xd0] sm:$0xf0]  ;;  %v2314_v47 = vor.u32 %v2047_v38, %v1953_v37  ;;  %v2041_v48 = vld [vmem:[#allocation6 + $0xcc] sm:$0xf]  ;;  %v2320_v53 = vor.u32 %v2042_v44, %v1929_v41 }
  0x26   :  { %v1939_v49 = vld [vmem:[#allocation6 + $0xd8] sm:$0xf0]  ;;  %v1983_v50 = vld [vmem:[%s2821_s0] sm:$0xff]  ;;  %v1937_v51 = vld [vmem:[#allocation6 + $0xc8] sm:$0xf]  ;;  %v2324_v54 = vor.u32 %v2040_v45, %v1931_v46  ;;  %v2268_v26 = vmov 0  }
  0x27   :  { %270 = vmatpush.bf16.msra.mxu0 %v1722_v16  ;;  %v2043_v52 = vld [vmem:[#allocation6 + $0xd4] sm:$0xf0]  ;;  %v2326_v55 = vor.u32 %v2041_v48, %v1939_v49  ;;  %v1913_v56 = vld [vmem:[#allocation6 + $0xa0] sm:$0xf]  ;;  %v2038_v57 = vld [vmem:[#allocation6 + $0xac] sm:$0xf0]  ;;  %2056 = vset.pattern.permute.xlu0 %v2268_v26 }
  0x28   :  { %284 = vmatpush.bf16.msra.mxu1 %v1726_v19  ;;  %v2036_v58 = vld [vmem:[#allocation6 + $0xa4] sm:$0xf]  ;;  %v2329_v59 = vor.u32 %v2043_v52, %v1937_v51  ;;  %v1915_v60 = vld [vmem:[#allocation6 + $0xb0] sm:$0xf0]  ;;  %v2037_v61 = vld [vmem:[#allocation6 + $0xac] sm:$0xf]  ;;  %v2332_v1 = vor.u32 %v2038_v57, %v1913_v56  ;;  %2057 = vset.pattern.permute.xlu1 %v2268_v26 }
  0x29   :  { %312 = vmatpush.bf16.msra.mxu3 %v1734_v20  ;;  %298 = vmatpush.bf16.msra.mxu2 %v1730_v24  ;;  %v1923_v62 = vld [vmem:[#allocation6 + $0xb8] sm:$0xf0]  ;;  %v1921_v63 = vld [vmem:[#allocation6 + $0xa8] sm:$0xf]  ;;  %v2039_v0 = vld [vmem:[#allocation6 + $0xb4] sm:$0xf0]  ;;  %v2336_v2 = vor.u32 %v2036_v58, %v1915_v60 }
  0x2a   :  { %v2338_v3 = vor.u32 %v2037_v61, %v1923_v62  ;;  %v1897_v4 = vld [vmem:[#allocation6 + $0x80] sm:$0xf]  ;;  %v2034_v5 = vld [vmem:[#allocation6 + $0x8c] sm:$0xf0]  ;;  %v2032_v6 = vld [vmem:[#allocation6 + $0x84] sm:$0xf]  ;;  %v2341_v7 = vor.u32 %v2039_v0, %v1921_v63 }
  0x2b   :  { %271 = vmatpush.bf16.msra.mxu0 %v1706_v31  ;;  %v1899_v8 = vld [vmem:[#allocation6 + $0x90] sm:$0xf0]  ;;  %v2033_v9 = vld [vmem:[#allocation6 + $0x8c] sm:$0xf]  ;;  %v1907_v10 = vld [vmem:[#allocation6 + $0x98] sm:$0xf0]  ;;  %v2344_v13 = vor.u32 %v2034_v5, %v1897_v4 }
  0x2c   :  { %285 = vmatpush.bf16.msra.mxu1 %v1710_v35  ;;  %v1905_v11 = vld [vmem:[#allocation6 + $0x88] sm:$0xf]  ;;  %v2035_v12 = vld [vmem:[#allocation6 + $0x94] sm:$0xf0]  ;;  %v1881_v14 = vld [vmem:[#allocation6 + $0x60] sm:$0xf]  ;;  %v2348_v15 = vor.u32 %v2032_v6, %v1899_v8  ;;  %v2350_v16 = vor.u32 %v2033_v9, %v1907_v10 }
  0x2d   :  { %313 = vmatpush.bf16.msra.mxu3 %v1718_v36  ;;  %299 = vmatpush.bf16.msra.mxu2 %v1714_v39  ;;  %v2030_v17 = vld [vmem:[#allocation6 + $0x6c] sm:$0xf0]  ;;  %v2028_v18 = vld [vmem:[#allocation6 + $0x64] sm:$0xf]  ;;  %v1883_v19 = vld [vmem:[#allocation6 + $0x70] sm:$0xf0]  ;;  %v2353_v20 = vor.u32 %v2035_v12, %v1905_v11 }
  0x2e   :  { %272 = vmatmul.bf16.vlgmr.msra.gmra.mxu0 %v1983_v50  ;;  %v2029_v21 = vld [vmem:[#allocation6 + $0x6c] sm:$0xf]  ;;  %v1891_v22 = vld [vmem:[#allocation6 + $0x78] sm:$0xf0]  ;;  %v352_v23 = vld [vmem:[%s2822_s1] sm:$0xff]  ;;  %v2361_v27 = vor.u32 %v2030_v17, %v1881_v14  ;;  %v2365_v28 = vor.u32 %v2028_v18, %v1883_v19  ;;  %s1685_s12 = sshll.u32 %s2826_s5, 4  ;;  %s1686_s12 = int_to_ptr.hbm [resolvable:$true] %s1685_s12 }
  0x2f   :  { %514 = vmatpush.bf16.msrb.mxu0 %v2308_v40  ;;  %286 = vmatmul.bf16.vlgmr.msra.gmra.mxu1 %v1983_v50  ;;  %v1889_v24 = vld [vmem:[#allocation6 + $0x68] sm:$0xf]  ;;  %v2031_v25 = vld [vmem:[#allocation6 + $0x74] sm:$0xf0]  ;;  %v2367_v29 = vor.u32 %v2029_v21, %v1891_v22  ;;  %v1865_v30 = vld [vmem:[#allocation6 + $0x40] sm:$0xf] }
  0x30   :  { %527 = vmatpush.bf16.msrb.mxu1 %v2310_v42  ;;  %314 = vmatmul.bf16.vlgmr.msra.gmra.mxu3 %v1983_v50  ;;  %v2026_v31 = vld [vmem:[#allocation6 + $0x4c] sm:$0xf0]  ;;  %v2024_v32 = vld [vmem:[#allocation6 + $0x44] sm:$0xf]  ;;  %v2370_v33 = vor.u32 %v2031_v25, %v1889_v24  ;;  %v1867_v34 = vld [vmem:[#allocation6 + $0x50] sm:$0xf0] }
  0x31   :  { %553 = vmatpush.bf16.msrb.mxu3 %v2312_v43  ;;  %540 = vmatpush.bf16.msrb.mxu2 %v2314_v47  ;;  %v2025_v35 = vld [vmem:[#allocation6 + $0x4c] sm:$0xf]  ;;  %v1875_v36 = vld [vmem:[#allocation6 + $0x58] sm:$0xf0]  ;;  %v1873_v37 = vld [vmem:[#allocation6 + $0x48] sm:$0xf]  ;;  %v2373_v39 = vor.u32 %v2026_v31, %v1865_v30  ;;  %v2377_v44 = vor.u32 %v2024_v32, %v1867_v34 }
  0x32   :  { %300 = vmatmul.bf16.vlgmr.msra.gmra.mxu2 %v1983_v50  ;;  %635 = vperm.xlu0 %2056, %v352_v23   ;;  %v2027_v38 = vld [vmem:[#allocation6 + $0x54] sm:$0xf0]  ;;  %v639_v41 = vsub.f32 1.0, %v352_v23  ;;  %v2379_v45 = vor.u32 %v2025_v35, %v1875_v36  ;;  %v1849_v46 = vld [vmem:[#allocation6 + $0x20] sm:$0xf]  ;;  %s2270_s13 = smov 64  }
  0x33   :  { %515 = vmatpush.bf16.msrb.mxu0 %v2320_v53  ;;  %v2022_v48 = vld [vmem:[#allocation6 + $0x2c] sm:$0xf0]  ;;  %v2020_v49 = vld [vmem:[#allocation6 + $0x24] sm:$0xf]  ;;  %v2382_v50 = vor.u32 %v2027_v38, %v1873_v37  ;;  %v1851_v51 = vld [vmem:[#allocation6 + $0x30] sm:$0xf0] }
  0x34   :  { %528 = vmatpush.bf16.msrb.mxu1 %v2324_v54  ;;  %v2021_v52 = vld [vmem:[#allocation6 + $0x2c] sm:$0xf]  ;;  %v1859_v56 = vld [vmem:[#allocation6 + $0x38] sm:$0xf0]  ;;  %v1857_v57 = vld [vmem:[#allocation6 + $0x28] sm:$0xf]  ;;  %v2385_v60 = vor.u32 %v2022_v48, %v1849_v46  ;;  %v2389_v61 = vor.u32 %v2020_v49, %v1851_v51 }
  0x35   :  { %554 = vmatpush.bf16.msrb.mxu3 %v2326_v55  ;;  %541 = vmatpush.bf16.msrb.mxu2 %v2329_v59  ;;  %v2023_v58 = vld [vmem:[#allocation6 + $0x34] sm:$0xf0]  ;;  %v2391_v62 = vor.u32 %v2021_v52, %v1859_v56  ;;  %v1833_v63 = vld [vmem:[#allocation6] sm:$0xf]  ;;  %v2018_v0 = vld [vmem:[#allocation6 + $0xc] sm:$0xf0] }
  0x36   :  { %v2016_v4 = vld [vmem:[#allocation6 + $0x4] sm:$0xf]  ;;  %v2394_v5 = vor.u32 %v2023_v58, %v1857_v57  ;;  %v1835_v6 = vld [vmem:[#allocation6 + $0x10] sm:$0xf0]  ;;  %v2017_v8 = vld [vmem:[#allocation6 + $0xc] sm:$0xf]  ;;  %v2397_v12 = vor.u32 %v2018_v0, %v1833_v63 }
  0x37   :  { %516 = vmatpush.bf16.msrb.mxu0 %v2332_v1  ;;  %v1843_v9 = vld [vmem:[#allocation6 + $0x18] sm:$0xf0]  ;;  %v1841_v10 = vld [vmem:[#allocation6 + $0x8] sm:$0xf]  ;;  %v2019_v11 = vld [vmem:[#allocation6 + $0x14] sm:$0xf0]  ;;  %v2401_v14 = vor.u32 %v2016_v4, %v1835_v6 }
  0x38   :  { %529 = vmatpush.bf16.msrb.mxu1 %v2336_v2  ;;  %v2403_v17 = vor.u32 %v2017_v8, %v1843_v9  ;;  %v2406_v18 = vor.u32 %v2019_v11, %v1841_v10  ;;  %v88_v22 = vld [vmem:[%s2825_s4] sm:$0xf]  ;;  %s2271_s14 = smov 4  }
  0x39   :  { %555 = vmatpush.bf16.msrb.mxu3 %v2338_v3  ;;  %542 = vmatpush.bf16.msrb.mxu2 %v2341_v7  ;;  %v90_v23 = vperm.slane %v88_v22, 0  ;;  %v91_v24 = vperm.slane %v88_v22, 1  ;;  %v93_v35 = vperm.slane %v88_v22, 3  ;;  %v92_v36 = vperm.slane %v88_v22, 2 }
  0x3a   :  { %642 = vperm.xlu0 %2056, %v639_v41  }
  0x3b   :  { %517 = vmatpush.bf16.msrb.mxu0 %v2344_v13 }
  0x3c   :  { %530 = vmatpush.bf16.msrb.mxu1 %v2348_v15 }
  0x3d   :  { %556 = vmatpush.bf16.msrb.mxu3 %v2350_v16  ;;  %543 = vmatpush.bf16.msrb.mxu2 %v2353_v20 }
  0x3f   :  { %518 = vmatpush.bf16.msrb.mxu0 %v2361_v27 }
  0x40   :  { %531 = vmatpush.bf16.msrb.mxu1 %v2365_v28 }
  0x41   :  { %557 = vmatpush.bf16.msrb.mxu3 %v2367_v29  ;;  %544 = vmatpush.bf16.msrb.mxu2 %v2370_v33 }
  0x43   :  { %519 = vmatpush.bf16.msrb.mxu0 %v2373_v39 }
  0x44   :  { %532 = vmatpush.bf16.msrb.mxu1 %v2377_v44 }
  0x45   :  { %558 = vmatpush.bf16.msrb.mxu3 %v2379_v45  ;;  %545 = vmatpush.bf16.msrb.mxu2 %v2382_v50 }
  0x47   :  { %520 = vmatpush.bf16.msrb.mxu0 %v2385_v60 }
  0x48   :  { %533 = vmatpush.bf16.msrb.mxu1 %v2389_v61 }
  0x49   :  { %559 = vmatpush.bf16.msrb.mxu3 %v2391_v62  ;;  %546 = vmatpush.bf16.msrb.mxu2 %v2394_v5 }
  0x4b   :  { %521 = vmatpush.bf16.msrb.mxu0 %v2397_v12 }
  0x4c   :  { %534 = vmatpush.bf16.msrb.mxu1 %v2401_v14 }
  0x4d   :  { %560 = vmatpush.bf16.msrb.mxu3 %v2403_v17  ;;  %547 = vmatpush.bf16.msrb.mxu2 %v2406_v18 }
  0x4e   :  { %522 = vmatmul.bf16.vlgmr.msrb.gmra.mxu0 %v2268_v26 }
  0x4f   :  { %652 = vmatpush.bf16.msra.mxu0 %v2308_v40  ;;  %535 = vmatmul.bf16.vlgmr.msrb.gmra.mxu1 %v2268_v26 }
  0x50   :  { %665 = vmatpush.bf16.msra.mxu1 %v2310_v42  ;;  %561 = vmatmul.bf16.vlgmr.msrb.gmra.mxu3 %v2268_v26 }
  0x51   :  { %548 = vmatmul.bf16.vlgmr.msrb.gmra.mxu2 %v2268_v26  ;;  %691 = vmatpush.bf16.msra.mxu3 %v2312_v43 }
  0x52   :  { %678 = vmatpush.bf16.msra.mxu2 %v2314_v47 }
  0x53   :  { %653 = vmatpush.bf16.msra.mxu0 %v2320_v53 }
  0x54   :  { %666 = vmatpush.bf16.msra.mxu1 %v2324_v54 }
  0x55   :  { %692 = vmatpush.bf16.msra.mxu3 %v2326_v55 }
  0x56   :  { %679 = vmatpush.bf16.msra.mxu2 %v2329_v59 }
  0x57   :  { %654 = vmatpush.bf16.msra.mxu0 %v2332_v1 }
  0x58   :  { %667 = vmatpush.bf16.msra.mxu1 %v2336_v2 }
  0x59   :  { %693 = vmatpush.bf16.msra.mxu3 %v2338_v3 }
  0x5a   :  { %680 = vmatpush.bf16.msra.mxu2 %v2341_v7 }
  0x5b   :  { %655 = vmatpush.bf16.msra.mxu0 %v2344_v13 }
  0x5c   :  { %668 = vmatpush.bf16.msra.mxu1 %v2348_v15 }
  0x5d   :  { %694 = vmatpush.bf16.msra.mxu3 %v2350_v16 }
  0x5e   :  { %681 = vmatpush.bf16.msra.mxu2 %v2353_v20 }
  0x5f   :  { %656 = vmatpush.bf16.msra.mxu0 %v2361_v27 }
  0x60   :  { %669 = vmatpush.bf16.msra.mxu1 %v2365_v28 }
  0x61   :  { %695 = vmatpush.bf16.msra.mxu3 %v2367_v29 }
  0x62   :  { %682 = vmatpush.bf16.msra.mxu2 %v2370_v33 }
  0x63   :  { %657 = vmatpush.bf16.msra.mxu0 %v2373_v39 }
  0x64   :  { %670 = vmatpush.bf16.msra.mxu1 %v2377_v44 }
  0x65   :  { %696 = vmatpush.bf16.msra.mxu3 %v2379_v45 }
  0x66   :  { %683 = vmatpush.bf16.msra.mxu2 %v2382_v50 }
  0x67   :  { %658 = vmatpush.bf16.msra.mxu0 %v2385_v60 }
  0x68   :  { %671 = vmatpush.bf16.msra.mxu1 %v2389_v61 }
  0x69   :  { %697 = vmatpush.bf16.msra.mxu3 %v2391_v62 }
  0x6a   :  { %684 = vmatpush.bf16.msra.mxu2 %v2394_v5 }
  0x6b   :  { %659 = vmatpush.bf16.msra.mxu0 %v2397_v12 }
  0x6c   :  { %672 = vmatpush.bf16.msra.mxu1 %v2401_v14 }
  0x6d   :  { %698 = vmatpush.bf16.msra.mxu3 %v2403_v17 }
  0x6e   :  { %685 = vmatpush.bf16.msra.mxu2 %v2406_v18 }
  0x6f   :  { %801 = vmatpush.bf16.msrb.mxu0 %v2308_v40 }
  0x70   :  { %814 = vmatpush.bf16.msrb.mxu1 %v2310_v42 }
  0x71   :  { %840 = vmatpush.bf16.msrb.mxu3 %v2312_v43 }
  0x72   :  { %827 = vmatpush.bf16.msrb.mxu2 %v2314_v47 }
  0x73   :  { %802 = vmatpush.bf16.msrb.mxu0 %v2320_v53 }
  0x74   :  { %815 = vmatpush.bf16.msrb.mxu1 %v2324_v54 }
  0x75   :  { %841 = vmatpush.bf16.msrb.mxu3 %v2326_v55 }
  0x76   :  { %828 = vmatpush.bf16.msrb.mxu2 %v2329_v59 }
  0x77   :  { %803 = vmatpush.bf16.msrb.mxu0 %v2332_v1 }
  0x78   :  { %816 = vmatpush.bf16.msrb.mxu1 %v2336_v2 }
  0x79   :  { %842 = vmatpush.bf16.msrb.mxu3 %v2338_v3 }
  0x7a   :  { %829 = vmatpush.bf16.msrb.mxu2 %v2341_v7 }
  0x7b   :  { %804 = vmatpush.bf16.msrb.mxu0 %v2344_v13 }
  0x7c   :  { %817 = vmatpush.bf16.msrb.mxu1 %v2348_v15 }
  0x7d   :  { %843 = vmatpush.bf16.msrb.mxu3 %v2350_v16 }
  0x7e   :  { %830 = vmatpush.bf16.msrb.mxu2 %v2353_v20 }
  0x7f   :  { %805 = vmatpush.bf16.msrb.mxu0 %v2361_v27 }
  0x80   :  { %818 = vmatpush.bf16.msrb.mxu1 %v2365_v28 }
  0x81   :  { %844 = vmatpush.bf16.msrb.mxu3 %v2367_v29 }
  0x82   :  { %831 = vmatpush.bf16.msrb.mxu2 %v2370_v33 }
  0x83   :  { %806 = vmatpush.bf16.msrb.mxu0 %v2373_v39 }
  0x84   :  { %819 = vmatpush.bf16.msrb.mxu1 %v2377_v44 }
  0x85   :  { %845 = vmatpush.bf16.msrb.mxu3 %v2379_v45 }
  0x86   :  { %832 = vmatpush.bf16.msrb.mxu2 %v2382_v50 }
  0x87   :  { %807 = vmatpush.bf16.msrb.mxu0 %v2385_v60 }
  0x88   :  { %820 = vmatpush.bf16.msrb.mxu1 %v2389_v61 }
  0x89   :  { %846 = vmatpush.bf16.msrb.mxu3 %v2391_v62 }
  0x8a   :  { %833 = vmatpush.bf16.msrb.mxu2 %v2394_v5 }
  0x8b   :  { %808 = vmatpush.bf16.msrb.mxu0 %v2397_v12 }
  0x8c   :  { %821 = vmatpush.bf16.msrb.mxu1 %v2401_v14 }
  0x8d   :  { %847 = vmatpush.bf16.msrb.mxu3 %v2403_v17 }
  0x8e   :  { %834 = vmatpush.bf16.msrb.mxu2 %v2406_v18 }
  0xab   :  { %v273_v19 = vpop.f32.mrf.mxu0 }
  0xac   :  { %v287_v21 = vpop.f32.mrf.mxu1  ;;  %v2491_v48 = vadd.f32 %v273_v19, %v90_v23 }
  0xad   :  { %v2493_v49 = vadd.f32 %v287_v21, %v91_v24 }
  0xb3   :  { %v315_v25 = vpop.f32.mrf.mxu3  ;;  %v275_v26 = vpop.f32.mrf.mxu0 }
  0xb4   :  { %v2483_v31 = vadd.f32 %v275_v26, %v90_v23  ;;  %v289_v32 = vpop.f32.mrf.mxu1  ;;  %v2497_v0 = vadd.f32 %v315_v25, %v93_v35 }
  0xb5   :  { %v301_v30 = vpop.f32.mrf.mxu2  ;;  %v2485_v34 = vadd.f32 %v289_v32, %v91_v24 }
  0xb6   :  { %2834 = vst [vmem:[#allocation12_spill] sm:$0xff] %v2483_v31  ;;  %v2500_v26 = vadd.f32 %v301_v30, %v92_v36 }
  0xb7   :  { %2835 = vst [vmem:[#allocation13_spill] sm:$0xff] %v2485_v34 }
  0xb8   :  { %2838 = vst [vmem:[#allocation16_spill] sm:$0xff] %v2497_v0 }
  0xb9   :  { %2839 = vst [vmem:[#allocation17_spill] sm:$0xff] %v2500_v26 }
  0xbb   :  { %v317_v37 = vpop.f32.mrf.mxu3 }
  0xbc   :  { %v2487_v38 = vadd.f32 %v317_v37, %v93_v35 }
  0xbd   :  { %v303_v41 = vpop.f32.mrf.mxu2 }
  0xbe   :  { %2836 = vst [vmem:[#allocation14_spill] sm:$0xff] %v2487_v38  ;;  %v2489_v46 = vadd.f32 %v303_v41, %v92_v36 }
  0xc0   :  { %2837 = vst [vmem:[#allocation15_spill] sm:$0xff] %v2489_v46 }
  0xcb   :  { %v523_v51 = vpop.f32.mrf.mxu0 }
  0xcc   :  { %v566_v52 = vadd.f32 %v523_v51, %v2491_v48  ;;  %v536_v56 = vpop.f32.mrf.mxu1 }
  0xcd   :  { %v567_v57 = vadd.f32 %v536_v56, %v2493_v49  ;;  %v2503_v56 = vpop.permute.xlu0 %635 }
  0xce   :  { %v1959_v58 = vmul.f32 -1.442695, %v566_v52 }
  0xcf   :  { %v1960_v63 = vmul.f32 -1.442695, %v567_v57 }
  0xd0   :  { %2058 = vpow2.f32 %v1959_v58 }
  0xd1   :  { %2060 = vpow2.f32 %v1960_v63 }
  0xd3   :  { %v562_v4 = vpop.f32.mrf.mxu3  ;;  %v525_v9 = vpop.f32.mrf.mxu0 }
  0xd4   :  { %v569_v6 = vadd.f32 %v562_v4, %v2497_v0  ;;  %v549_v8 = vpop.f32.mrf.mxu2  ;;  %v538_v10 = vpop.f32.mrf.mxu1 }
  0xd5   :  { %v568_v41 = vadd.f32 %v549_v8, %v2500_v26  ;;  %v2505_v38 = vpop.permute.xlu0 %642 }
  0xd6   :  { %v1961_v11 = vmul.f32 -1.442695, %v569_v6  ;;  %v2059_v19 = vpop.eup %2058  ;;  %v645_v34 = vmul.f32 0.0, %v2505_v38 }
  0xd7   :  { %v2061_v21 = vpop.eup %2060  ;;  %v573_v22 = vadd.f32 1.0, %v2059_v19 }
  0xd8   :  { %2062 = vpow2.f32 %v1961_v11  ;;  %v592_v23 = vadd.f32 1.0, %v2061_v21 }
  0xd9   :  { %2064 = vrcp.f32 %v573_v22  ;;  %v585_v4 = vand.u32 2147483648, %v573_v22  ;;  %v583_v30 = vand.u32 2147483647, %v573_v22  ;;  %vm579_vm2 = vweird.f32 %v573_v22 }
  0xda   :  { %2066 = vrcp.f32 %v592_v23  ;;  %v604_v6 = vand.u32 2147483648, %v592_v23  ;;  %v602_v10 = vand.u32 2147483647, %v592_v23  ;;  %vm598_vm3 = vweird.f32 %v592_v23 }
  0xdb   :  { %v564_v24 = vpop.f32.mrf.mxu3  ;;  %v586_v21 = vor.u32 1.1754944e-38, %v585_v4  ;;  %vm584_vm5 = vcmp.eq.f32.partialorder %v583_v30, 8.507059e+37 }
  0xdc   :  { %v551_v25 = vpop.f32.mrf.mxu2  ;;  %vm603_vm7 = vcmp.eq.f32.partialorder %v602_v10, 8.507059e+37 }
  0xdd   :  { %v605_v25 = vor.u32 1.1754944e-38, %v604_v6 }
  0xde   :  { %v2063_v32 = vpop.eup %2062 }
  0xdf   :  { %v612_v35 = vadd.f32 1.0, %v2063_v32  ;;  %v2065_v37 = vpop.eup %2064 }
  0xe0   :  { %v2067_v51 = vpop.eup %2066  ;;  %v575_v52 = vmul.f32 %v2065_v37, %v573_v22  ;;  %vm580_vm0 = vweird.f32 %v2065_v37 }
  0xe1   :  { %2068 = vrcp.f32 %v612_v35  ;;  %v594_v57 = vmul.f32 %v2067_v51, %v592_v23  ;;  %vm599_vm1 = vweird.f32 %v2067_v51  ;;  %vm581_vm4 = vmor %vm579_vm2, %vm580_vm0  ;;  %v624_v6 = vand.u32 2147483648, %v612_v35 }
  0xe2   :  { %v576_v58 = vsub.f32 1.0, %v575_v52  ;;  %2070 = vtanh.f32 %v568_v41  ;;  %vm600_vm6 = vmor %vm598_vm3, %vm599_vm1  ;;  %vm618_vm9 = vweird.f32 %v612_v35  ;;  %v622_v30 = vand.u32 2147483647, %v612_v35 }
  0xe3   :  { %v595_v63 = vsub.f32 1.0, %v594_v57  ;;  %v625_v10 = vor.u32 1.1754944e-38, %v624_v6 }
  0xe4   :  { %v577_v9 = vmul.f32 %v2065_v37, %v576_v58  ;;  %vm623_vm11 = vcmp.eq.f32.partialorder %v622_v30, 8.507059e+37 }
  0xe5   :  { %v596_v36 = vmul.f32 %v2067_v51, %v595_v63 }
  0xe6   :  { %v578_v19 = vadd.f32 %v2065_v37, %v577_v9 }
  0xe7   :  { %v2069_v11 = vpop.eup %2068  ;;  %v597_v24 = vadd.f32 %v2067_v51, %v596_v36 }
  0xe8   :  { %v614_v8 = vmul.f32 %v2069_v11, %v612_v35  ;;  %v582_v32 = vsel %vm581_vm4, %v2065_v37, %v578_v19  ;;  %v2071_v41 = vpop.eup %2070  ;;  %vm619_vm8 = vweird.f32 %v2069_v11 }
  0xe9   :  { %v587_v57 = vsel %vm584_vm5, %v586_v21, %v582_v32  ;;  %v601_v58 = vsel %vm600_vm6, %v2067_v51, %v597_v24  ;;  %vm620_vm10 = vmor %vm618_vm9, %vm619_vm8 }
  0xea   :  { %v615_v52 = vsub.f32 1.0, %v614_v8  ;;  %v606_v63 = vsel %vm603_vm7, %v605_v25, %v601_v58  ;;  %v629_v46 = vmul.f32 %v2071_v41, %v587_v57 }
  0xeb   :  { %v628_v22 = vmul.f32 0.0, %v606_v63 }
  0xec   :  { %v616_v9 = vmul.f32 %v2069_v11, %v615_v52 }
  0xed   :  { %v630_v23 = vadd.f32 %v629_v46, %v628_v22 }
  0xee   :  { %v617_v4 = vadd.f32 %v2069_v11, %v616_v9 }
  0xef   :  { %2072 = vtanh.f32 %v630_v23  ;;  %v638_v37 = vmul.f32 %v2503_v56, %v630_v23 }
  0xf0   :  { %v621_v36 = vsel %vm620_vm10, %v2069_v11, %v617_v4 }
  0xf1   :  { %v2509_v51 = vadd.f32 %v645_v34, %v638_v37  ;;  %v626_v8 = vsel %vm623_vm11, %v625_v10, %v621_v36 }
  0xf5   :  { %v2073_v19 = vpop.eup %2072 }
  0xf6   :  { %v632_v21 = vmul.f32 %v2073_v19, %v626_v8 }
  0xf8   :  { %v647_v46 = vmul.f32 %v2503_v56, %v632_v21 }
  0xfa   :  { %v2512_v24 = vadd.f32 %v647_v46, %v645_v34  ;;  %v649_v25 = vpack.c.bf16 %v647_v46, %v647_v46 }
  0xfc   :  { %650 = vst [vmem:[#allocation8] sm:$0x1] %v649_v25  ;;  %v651_v32 = vpack.c.bf16 %v2512_v24, %v2512_v24 }
  0xfe   :  { %660 = vmatmul.bf16.vlgmr.msra.gmra.mxu0 %v651_v32  ;;  %673 = vmatmul.bf16.vlgmr.msra.gmra.mxu1 %v651_v32 }
  0xff   :  { %686 = vmatmul.bf16.vlgmr.msra.gmra.mxu2 %v651_v32  ;;  %699 = vmatmul.bf16.vlgmr.msra.gmra.mxu3 %v651_v32 }
 0x100   :  { %950 = vmatpush.bf16.msra.mxu0 %v2308_v40  ;;  %963 = vmatpush.bf16.msra.mxu1 %v2310_v42 }
 0x101   :  { %976 = vmatpush.bf16.msra.mxu2 %v2314_v47  ;;  %989 = vmatpush.bf16.msra.mxu3 %v2312_v43 }
 0x104   :  { %951 = vmatpush.bf16.msra.mxu0 %v2320_v53  ;;  %964 = vmatpush.bf16.msra.mxu1 %v2324_v54 }
 0x105   :  { %977 = vmatpush.bf16.msra.mxu2 %v2329_v59  ;;  %990 = vmatpush.bf16.msra.mxu3 %v2326_v55 }
 0x108   :  { %952 = vmatpush.bf16.msra.mxu0 %v2332_v1  ;;  %965 = vmatpush.bf16.msra.mxu1 %v2336_v2 }
 0x109   :  { %978 = vmatpush.bf16.msra.mxu2 %v2341_v7  ;;  %991 = vmatpush.bf16.msra.mxu3 %v2338_v3 }
 0x10c   :  { %953 = vmatpush.bf16.msra.mxu0 %v2344_v13  ;;  %966 = vmatpush.bf16.msra.mxu1 %v2348_v15 }
 0x10d   :  { %979 = vmatpush.bf16.msra.mxu2 %v2353_v20  ;;  %992 = vmatpush.bf16.msra.mxu3 %v2350_v16 }
 0x110   :  { %954 = vmatpush.bf16.msra.mxu0 %v2361_v27  ;;  %967 = vmatpush.bf16.msra.mxu1 %v2365_v28 }
 0x111   :  { %980 = vmatpush.bf16.msra.mxu2 %v2370_v33  ;;  %993 = vmatpush.bf16.msra.mxu3 %v2367_v29 }
 0x114   :  { %955 = vmatpush.bf16.msra.mxu0 %v2373_v39  ;;  %968 = vmatpush.bf16.msra.mxu1 %v2377_v44 }
 0x115   :  { %981 = vmatpush.bf16.msra.mxu2 %v2382_v50  ;;  %994 = vmatpush.bf16.msra.mxu3 %v2379_v45 }
 0x118   :  { %956 = vmatpush.bf16.msra.mxu0 %v2385_v60  ;;  %969 = vmatpush.bf16.msra.mxu1 %v2389_v61 }
 0x119   :  { %982 = vmatpush.bf16.msra.mxu2 %v2394_v5  ;;  %995 = vmatpush.bf16.msra.mxu3 %v2391_v62 }
 0x11c   :  { %957 = vmatpush.bf16.msra.mxu0 %v2397_v12  ;;  %970 = vmatpush.bf16.msra.mxu1 %v2401_v14 }
 0x11d   :  { %983 = vmatpush.bf16.msra.mxu2 %v2406_v18  ;;  %996 = vmatpush.bf16.msra.mxu3 %v2403_v17 }
 0x17b   :  { %v661_v34 = vpop.f32.mrf.mxu0  ;;  %v674_v35 = vpop.f32.mrf.mxu1 }
 0x17c   :  { %v708_v11 = vrot.slane %v661_v34, 6  ;;  %v709_v41 = vrot.slane %v674_v35, 6 }
 0x17e   :  { %v716_v52 = vadd.f32 %v708_v11, %v2491_v48  ;;  %v717_v57 = vadd.f32 %v709_v41, %v2493_v49 }
 0x180   :  { %v1962_v58 = vmul.f32 -1.442695, %v716_v52  ;;  %v1963_v63 = vmul.f32 -1.442695, %v717_v57 }
 0x182   :  { %2074 = vpow2.f32 %v1962_v58  ;;  %v687_v9 = vpop.f32.mrf.mxu2  ;;  %v700_v22 = vpop.f32.mrf.mxu3 }
 0x183   :  { %2076 = vpow2.f32 %v1963_v63  ;;  %v711_v23 = vrot.slane %v700_v22, 6  ;;  %v663_v4 = vpop.f32.mrf.mxu0  ;;  %v676_v6 = vpop.f32.mrf.mxu1  ;;  %v710_v25 = vrot.slane %v687_v9, 6 }
 0x185   :  { %v719_v37 = vadd.f32 %v711_v23, %v2497_v0  ;;  %v718_v11 = vadd.f32 %v710_v25, %v2500_v26  ;;  %v779_v25 = vrot.slane %v2509_v51, 6 }
 0x187   :  { %v1964_v30 = vmul.f32 -1.442695, %v719_v37 }
 0x188   :  { %v2075_v36 = vpop.eup %2074 }
 0x189   :  { %v2077_v10 = vpop.eup %2076  ;;  %v723_v19 = vadd.f32 1.0, %v2075_v36  ;;  %2078 = vpow2.f32 %v1964_v30 }
 0x18a   :  { %v742_v8 = vadd.f32 1.0, %v2077_v10  ;;  %v689_v21 = vpop.f32.mrf.mxu2  ;;  %v702_v46 = vpop.f32.mrf.mxu3 }
 0x18b   :  { %2080 = vrcp.f32 %v723_v19  ;;  %v735_v22 = vand.u32 2147483648, %v723_v19  ;;  %v733_v6 = vand.u32 2147483647, %v723_v19  ;;  %vm729_vm14 = vweird.f32 %v723_v19 }
 0x18c   :  { %2082 = vrcp.f32 %v742_v8  ;;  %v754_v23 = vand.u32 2147483648, %v742_v8  ;;  %v752_v9 = vand.u32 2147483647, %v742_v8  ;;  %vm748_vm15 = vweird.f32 %v742_v8 }
 0x18d   :  { %v736_v10 = vor.u32 1.1754944e-38, %v735_v22  ;;  %vm734_vm2 = vcmp.eq.f32.partialorder %v733_v6, 8.507059e+37 }
 0x18e   :  { %vm753_vm3 = vcmp.eq.f32.partialorder %v752_v9, 8.507059e+37 }
 0x18f   :  { %v2079_v32 = vpop.eup %2078 }
 0x190   :  { %v762_v34 = vadd.f32 1.0, %v2079_v32  ;;  %v755_v32 = vor.u32 1.1754944e-38, %v754_v23 }
 0x191   :  { %v2081_v35 = vpop.eup %2080 }
 0x192   :  { %v2083_v41 = vpop.eup %2082  ;;  %v725_v52 = vmul.f32 %v2081_v35, %v723_v19  ;;  %2084 = vrcp.f32 %v762_v34  ;;  %vm730_vm12 = vweird.f32 %v2081_v35  ;;  %v774_v23 = vand.u32 2147483648, %v762_v34 }
 0x193   :  { %v744_v57 = vmul.f32 %v2083_v41, %v742_v8  ;;  %2086 = vtanh.f32 %v718_v11  ;;  %vm749_vm13 = vweird.f32 %v2083_v41  ;;  %vm731_vm0 = vmor %vm729_vm14, %vm730_vm12  ;;  %vm768_vm5 = vweird.f32 %v762_v34 }
 0x194   :  { %v726_v58 = vsub.f32 1.0, %v725_v52  ;;  %vm750_vm1 = vmor %vm748_vm15, %vm749_vm13 }
 0x195   :  { %v745_v63 = vsub.f32 1.0, %v744_v57 }
 0x196   :  { %v727_v4 = vmul.f32 %v2081_v35, %v726_v58 }
 0x197   :  { %v746_v37 = vmul.f32 %v2083_v41, %v745_v63 }
 0x198   :  { %v2085_v30 = vpop.eup %2084  ;;  %v728_v36 = vadd.f32 %v2081_v35, %v727_v4 }
 0x199   :  { %v747_v21 = vadd.f32 %v2083_v41, %v746_v37  ;;  %v764_v46 = vmul.f32 %v2085_v30, %v762_v34  ;;  %v2087_v52 = vpop.eup %2086  ;;  %vm769_vm4 = vweird.f32 %v2085_v30  ;;  %v791_v37 = vrot.slane %v2512_v24, 6 }
 0x19a   :  { %v732_v11 = vsel %vm731_vm0, %v2081_v35, %v728_v36  ;;  %v772_v35 = vand.u32 2147483647, %v762_v34  ;;  %vm770_vm6 = vmor %vm768_vm5, %vm769_vm4 }
 0x19b   :  { %v737_v57 = vsel %vm734_vm2, %v736_v10, %v732_v11  ;;  %v751_v58 = vsel %vm750_vm1, %v2083_v41, %v747_v21  ;;  %v765_v63 = vsub.f32 1.0, %v764_v46  ;;  %v775_v41 = vor.u32 1.1754944e-38, %v774_v23 }
 0x19c   :  { %v756_v31 = vsel %vm753_vm3, %v755_v32, %v751_v58  ;;  %v782_v26 = vmul.f32 %v2087_v52, %v737_v57  ;;  %vm773_vm7 = vcmp.eq.f32.partialorder %v772_v35, 8.507059e+37 }
 0x19d   :  { %v781_v19 = vmul.f32 %v779_v25, %v756_v31  ;;  %v766_v8 = vmul.f32 %v2085_v30, %v765_v63 }
 0x19f   :  { %v2555_v22 = vadd.f32 %v782_v26, %v781_v19  ;;  %v767_v4 = vadd.f32 %v2085_v30, %v766_v8  ;;  %v793_v26 = vmul.f32 %v791_v37, %v2505_v38 }
 0x1a1   :  { %2088 = vtanh.f32 %v2555_v22  ;;  %v771_v6 = vsel %vm770_vm6, %v2085_v30, %v767_v4 }
 0x1a2   :  { %v776_v36 = vsel %vm773_vm7, %v775_v41, %v771_v6 }
 0x1a7   :  { %v2089_v9 = vpop.eup %2088 }
 0x1a8   :  { %v785_v10 = vmul.f32 %v2089_v9, %v776_v36 }
 0x1aa   :  { %v789_v31 = vmul.f32 %v785_v10, %v2503_v56 }
 0x1ac   :  { %v2561_v21 = vadd.f32 %v793_v26, %v789_v31  ;;  %v795_v46 = vpack.c.bf16 %v789_v31, %v789_v31 }
 0x1ae   :  { %796 = vst [vmem:[#allocation8] sm:$0x2] %v795_v46  ;;  %v797_v34 = vpack.c.bf16 %v2561_v21, %v2561_v21 }
 0x1b0   :  { %v799_v32 = vrot.slane %v797_v34, 1 }
 0x1b2   :  { %809 = vmatmul.bf16.vlgmr.msrb.gmra.mxu0 %v799_v32  ;;  %822 = vmatmul.bf16.vlgmr.msrb.gmra.mxu1 %v799_v32 }
 0x1b3   :  { %835 = vmatmul.bf16.vlgmr.msrb.gmra.mxu2 %v799_v32  ;;  %848 = vmatmul.bf16.vlgmr.msrb.gmra.mxu3 %v799_v32 }
 0x1b4   :  { %1099 = vmatpush.bf16.msrb.mxu0 %v2308_v40  ;;  %1112 = vmatpush.bf16.msrb.mxu1 %v2310_v42 }
 0x1b5   :  { %1125 = vmatpush.bf16.msrb.mxu2 %v2314_v47  ;;  %1138 = vmatpush.bf16.msrb.mxu3 %v2312_v43 }
 0x1b8   :  { %1100 = vmatpush.bf16.msrb.mxu0 %v2320_v53  ;;  %1113 = vmatpush.bf16.msrb.mxu1 %v2324_v54 }
 0x1b9   :  { %1126 = vmatpush.bf16.msrb.mxu2 %v2329_v59  ;;  %1139 = vmatpush.bf16.msrb.mxu3 %v2326_v55 }
 0x1bc   :  { %1101 = vmatpush.bf16.msrb.mxu0 %v2332_v1  ;;  %1114 = vmatpush.bf16.msrb.mxu1 %v2336_v2 }
 0x1bd   :  { %1127 = vmatpush.bf16.msrb.mxu2 %v2341_v7  ;;  %1140 = vmatpush.bf16.msrb.mxu3 %v2338_v3 }
 0x1c0   :  { %1102 = vmatpush.bf16.msrb.mxu0 %v2344_v13  ;;  %1115 = vmatpush.bf16.msrb.mxu1 %v2348_v15 }
 0x1c1   :  { %1128 = vmatpush.bf16.msrb.mxu2 %v2353_v20  ;;  %1141 = vmatpush.bf16.msrb.mxu3 %v2350_v16 }
 0x1c4   :  { %1103 = vmatpush.bf16.msrb.mxu0 %v2361_v27  ;;  %1116 = vmatpush.bf16.msrb.mxu1 %v2365_v28 }
 0x1c5   :  { %1129 = vmatpush.bf16.msrb.mxu2 %v2370_v33  ;;  %1142 = vmatpush.bf16.msrb.mxu3 %v2367_v29 }
 0x1c8   :  { %1104 = vmatpush.bf16.msrb.mxu0 %v2373_v39  ;;  %1117 = vmatpush.bf16.msrb.mxu1 %v2377_v44 }
 0x1c9   :  { %1130 = vmatpush.bf16.msrb.mxu2 %v2382_v50  ;;  %1143 = vmatpush.bf16.msrb.mxu3 %v2379_v45 }
 0x1cc   :  { %1105 = vmatpush.bf16.msrb.mxu0 %v2385_v60  ;;  %1118 = vmatpush.bf16.msrb.mxu1 %v2389_v61 }
 0x1cd   :  { %1131 = vmatpush.bf16.msrb.mxu2 %v2394_v5  ;;  %1144 = vmatpush.bf16.msrb.mxu3 %v2391_v62 }
 0x1d0   :  { %1106 = vmatpush.bf16.msrb.mxu0 %v2397_v12  ;;  %1119 = vmatpush.bf16.msrb.mxu1 %v2401_v14 }
 0x1d1   :  { %1132 = vmatpush.bf16.msrb.mxu2 %v2406_v18  ;;  %1145 = vmatpush.bf16.msrb.mxu3 %v2403_v17 }
 0x22f   :  { %v810_v24 = vpop.f32.mrf.mxu0  ;;  %v823_v30 = vpop.f32.mrf.mxu1 }
 0x230   :  { %v857_v11 = vrot.slane %v810_v24, 4  ;;  %v858_v52 = vrot.slane %v823_v30, 4 }
 0x232   :  { %v865_v57 = vadd.f32 %v857_v11, %v2491_v48  ;;  %v866_v58 = vadd.f32 %v858_v52, %v2493_v49  ;;  %v786_v11 = vmul.f32 %v2555_v22, %v2503_v56  ;;  %v2840_v52 = vld [vmem:[#allocation17_spill] sm:$0xff] }
 0x234   :  { %v1965_v63 = vmul.f32 -1.442695, %v865_v57  ;;  %v1966_v19 = vmul.f32 -1.442695, %v866_v58 }
 0x236   :  { %2090 = vpow2.f32 %v1965_v63  ;;  %v836_v8 = vpop.f32.mrf.mxu2  ;;  %v849_v4 = vpop.f32.mrf.mxu3 }
 0x237   :  { %2092 = vpow2.f32 %v1966_v19  ;;  %v860_v23 = vrot.slane %v849_v4, 4  ;;  %v812_v35 = vpop.f32.mrf.mxu0  ;;  %v825_v6 = vpop.f32.mrf.mxu1  ;;  %v859_v34 = vrot.slane %v836_v8, 4  ;;  %v787_v19 = vmul.f32 %v779_v25, %v2505_v38  ;;  %v353_v8 = vld [vmem:[%s2822_s1 + $0x8] sm:$0xff]  ;;  %s2269_s1 = smov [#allocation8]  }
 0x238   :  { %1223 = vperm.xlu1 %2057, %v353_v8   ;;  %s1683_s9 = sshll.u32 %s2269_s1, 4  ;;  %s1684_s9 = int_to_ptr.vmem [resolvable:$true] %s1683_s9 }
 0x239   :  { %v868_v41 = vadd.f32 %v860_v23, %v2497_v0  ;;  %v867_v57 = vadd.f32 %v859_v34, %v2840_v52  ;;  %v2609_v35 = vadd.f32 %v787_v19, %v786_v11 }
 0x23b   :  { %v1967_v37 = vmul.f32 -1.442695, %v868_v41 }
 0x23c   :  { %v2091_v9 = vpop.eup %2090 }
 0x23d   :  { %v2093_v36 = vpop.eup %2092  ;;  %v872_v10 = vadd.f32 1.0, %v2091_v9  ;;  %2094 = vpow2.f32 %v1967_v37 }
 0x23e   :  { %v891_v31 = vadd.f32 1.0, %v2093_v36  ;;  %v838_v26 = vpop.f32.mrf.mxu2  ;;  %v851_v46 = vpop.f32.mrf.mxu3 }
 0x23f   :  { %2096 = vrcp.f32 %v872_v10  ;;  %v884_v22 = vand.u32 2147483648, %v872_v10  ;;  %v882_v9 = vand.u32 2147483647, %v872_v10  ;;  %vm878_vm10 = vweird.f32 %v872_v10 }
 0x240   :  { %2098 = vrcp.f32 %v891_v31  ;;  %v903_v41 = vand.u32 2147483648, %v891_v31  ;;  %v901_v51 = vand.u32 2147483647, %v891_v31  ;;  %v1227_v46 = vsub.f32 1.0, %v353_v8 }
 0x241   :  { %vm897_vm11 = vweird.f32 %v891_v31  ;;  %v885_v34 = vor.u32 1.1754944e-38, %v884_v22  ;;  %vm883_vm14 = vcmp.eq.f32.partialorder %v882_v9, 8.507059e+37 }
 0x242   :  { %vm902_vm15 = vcmp.eq.f32.partialorder %v901_v51, 8.507059e+37  ;;  %1230 = vperm.xlu1 %2057, %v1227_v46  }
 0x243   :  { %v2095_v32 = vpop.eup %2094 }
 0x244   :  { %v911_v24 = vadd.f32 1.0, %v2095_v32 }
 0x245   :  { %v2097_v30 = vpop.eup %2096 }
 0x246   :  { %v2099_v58 = vpop.eup %2098  ;;  %v874_v63 = vmul.f32 %v2097_v30, %v872_v10  ;;  %2100 = vrcp.f32 %v911_v24  ;;  %vm879_vm8 = vweird.f32 %v2097_v30  ;;  %vm917_vm1 = vweird.f32 %v911_v24 }
 0x247   :  { %v893_v4 = vmul.f32 %v2099_v58, %v891_v31  ;;  %2102 = vtanh.f32 %v867_v57  ;;  %vm898_vm9 = vweird.f32 %v2099_v58  ;;  %vm880_vm12 = vmor %vm878_vm10, %vm879_vm8  ;;  %v928_v57 = vrot.slane %v2609_v35, 6 }
 0x248   :  { %v875_v23 = vsub.f32 1.0, %v874_v63  ;;  %vm899_vm13 = vmor %vm897_vm11, %vm898_vm9  ;;  %v904_v63 = vor.u32 1.1754944e-38, %v903_v41  ;;  %v921_v41 = vand.u32 2147483647, %v911_v24 }
 0x249   :  { %v894_v6 = vsub.f32 1.0, %v893_v4 }
 0x24a   :  { %v876_v37 = vmul.f32 %v2097_v30, %v875_v23  ;;  %vm922_vm3 = vcmp.eq.f32.partialorder %v921_v41, 8.507059e+37 }
 0x24b   :  { %v895_v36 = vmul.f32 %v2099_v58, %v894_v6 }
 0x24c   :  { %v2101_v25 = vpop.eup %2100  ;;  %v877_v26 = vadd.f32 %v2097_v30, %v876_v37 }
 0x24d   :  { %v896_v32 = vadd.f32 %v2099_v58, %v895_v36  ;;  %v913_v11 = vmul.f32 %v2101_v25, %v911_v24  ;;  %v2103_v4 = vpop.eup %2102  ;;  %vm918_vm0 = vweird.f32 %v2101_v25  ;;  %v940_v36 = vrot.slane %v2561_v21, 6 }
 0x24e   :  { %v881_v19 = vsel %vm880_vm12, %v2097_v30, %v877_v26  ;;  %v923_v30 = vand.u32 2147483648, %v911_v24  ;;  %vm919_vm2 = vmor %vm917_vm1, %vm918_vm0 }
 0x24f   :  { %v886_v23 = vsel %vm883_vm14, %v885_v34, %v881_v19  ;;  %v900_v6 = vsel %vm899_vm13, %v2099_v58, %v896_v32  ;;  %v914_v52 = vsub.f32 1.0, %v913_v11 }
 0x250   :  { %v905_v0 = vsel %vm902_vm15, %v904_v63, %v900_v6  ;;  %v931_v37 = vmul.f32 %v2103_v4, %v886_v23  ;;  %v924_v9 = vor.u32 1.1754944e-38, %v923_v30 }
 0x251   :  { %v930_v10 = vmul.f32 %v928_v57, %v905_v0  ;;  %v915_v31 = vmul.f32 %v2101_v25, %v914_v52  ;;  %v942_v52 = vmul.f32 %v940_v36, %v2505_v38 }
 0x253   :  { %v2614_v8 = vadd.f32 %v931_v37, %v930_v10  ;;  %v916_v22 = vadd.f32 %v2101_v25, %v915_v31 }
 0x255   :  { %2104 = vtanh.f32 %v2614_v8  ;;  %v920_v58 = vsel %vm919_vm2, %v2101_v25, %v916_v22 }
 0x256   :  { %v925_v26 = vsel %vm922_vm3, %v924_v9, %v920_v58  ;;  %v2841_v58 = vld [vmem:[#allocation16_spill] sm:$0xff] }
 0x25b   :  { %v2105_v51 = vpop.eup %2104 }
 0x25c   :  { %v934_v46 = vmul.f32 %v2105_v51, %v925_v26 }
 0x25e   :  { %v938_v0 = vmul.f32 %v934_v46, %v2503_v56 }
 0x260   :  { %v2620_v34 = vadd.f32 %v942_v52, %v938_v0  ;;  %v944_v32 = vpack.c.bf16 %v938_v0, %v938_v0 }
 0x262   :  { %945 = vst [vmem:[#allocation8] sm:$0x4] %v944_v32  ;;  %v946_v24 = vpack.c.bf16 %v2620_v34, %v2620_v34 }
 0x264   :  { %v948_v11 = vrot.slane %v946_v24, 2 }
 0x266   :  { %958 = vmatmul.bf16.vlgmr.msra.gmra.mxu0 %v948_v11  ;;  %971 = vmatmul.bf16.vlgmr.msra.gmra.mxu1 %v948_v11 }
 0x267   :  { %984 = vmatmul.bf16.vlgmr.msra.gmra.mxu2 %v948_v11  ;;  %997 = vmatmul.bf16.vlgmr.msra.gmra.mxu3 %v948_v11 }
 0x268   :  { %1244 = vmatpush.bf16.msra.mxu0 %v2308_v40  ;;  %1257 = vmatpush.bf16.msra.mxu1 %v2310_v42 }
 0x269   :  { %1270 = vmatpush.bf16.msra.mxu2 %v2314_v47  ;;  %1283 = vmatpush.bf16.msra.mxu3 %v2312_v43 }
 0x26c   :  { %1245 = vmatpush.bf16.msra.mxu0 %v2320_v53  ;;  %1258 = vmatpush.bf16.msra.mxu1 %v2324_v54 }
 0x26d   :  { %1271 = vmatpush.bf16.msra.mxu2 %v2329_v59  ;;  %1284 = vmatpush.bf16.msra.mxu3 %v2326_v55 }
 0x270   :  { %1246 = vmatpush.bf16.msra.mxu0 %v2332_v1  ;;  %1259 = vmatpush.bf16.msra.mxu1 %v2336_v2 }
 0x271   :  { %1272 = vmatpush.bf16.msra.mxu2 %v2341_v7  ;;  %1285 = vmatpush.bf16.msra.mxu3 %v2338_v3 }
 0x274   :  { %1247 = vmatpush.bf16.msra.mxu0 %v2344_v13  ;;  %1260 = vmatpush.bf16.msra.mxu1 %v2348_v15 }
 0x275   :  { %1273 = vmatpush.bf16.msra.mxu2 %v2353_v20  ;;  %1286 = vmatpush.bf16.msra.mxu3 %v2350_v16 }
 0x278   :  { %1248 = vmatpush.bf16.msra.mxu0 %v2361_v27  ;;  %1261 = vmatpush.bf16.msra.mxu1 %v2365_v28 }
 0x279   :  { %1274 = vmatpush.bf16.msra.mxu2 %v2370_v33  ;;  %1287 = vmatpush.bf16.msra.mxu3 %v2367_v29 }
 0x27c   :  { %1249 = vmatpush.bf16.msra.mxu0 %v2373_v39  ;;  %1262 = vmatpush.bf16.msra.mxu1 %v2377_v44 }
 0x27d   :  { %1275 = vmatpush.bf16.msra.mxu2 %v2382_v50  ;;  %1288 = vmatpush.bf16.msra.mxu3 %v2379_v45 }
 0x280   :  { %1250 = vmatpush.bf16.msra.mxu0 %v2385_v60  ;;  %1263 = vmatpush.bf16.msra.mxu1 %v2389_v61 }
 0x281   :  { %1276 = vmatpush.bf16.msra.mxu2 %v2394_v5  ;;  %1289 = vmatpush.bf16.msra.mxu3 %v2391_v62 }
 0x284   :  { %1251 = vmatpush.bf16.msra.mxu0 %v2397_v12  ;;  %1264 = vmatpush.bf16.msra.mxu1 %v2401_v14 }
 0x285   :  { %1277 = vmatpush.bf16.msra.mxu2 %v2406_v18  ;;  %1290 = vmatpush.bf16.msra.mxu3 %v2403_v17 }
 0x2e3   :  { %v959_v21 = vpop.f32.mrf.mxu0  ;;  %v972_v25 = vpop.f32.mrf.mxu1 }
 0x2e4   :  { %v1006_v63 = vrot.slane %v959_v21, 2  ;;  %v1007_v19 = vrot.slane %v972_v25, 2  ;;  %v935_v21 = vmul.f32 %v2614_v8, %v2503_v56  ;;  %v2842_v25 = vld [vmem:[#allocation17_spill] sm:$0xff] }
 0x2e6   :  { %v1014_v4 = vadd.f32 %v1006_v63, %v2491_v48  ;;  %v1015_v23 = vadd.f32 %v1007_v19, %v2493_v49 }
 0x2e8   :  { %v1968_v6 = vmul.f32 -1.442695, %v1014_v4  ;;  %v1969_v37 = vmul.f32 -1.442695, %v1015_v23  ;;  %v936_v23 = vmul.f32 %v928_v57, %v2505_v38 }
 0x2ea   :  { %2106 = vpow2.f32 %v1968_v6  ;;  %v985_v10 = vpop.f32.mrf.mxu2  ;;  %v998_v31 = vpop.f32.mrf.mxu3 }
 0x2eb   :  { %2108 = vpow2.f32 %v1969_v37  ;;  %v1009_v22 = vrot.slane %v998_v31, 2  ;;  %v961_v30 = vpop.f32.mrf.mxu0  ;;  %v974_v41 = vpop.f32.mrf.mxu1  ;;  %v1008_v49 = vrot.slane %v985_v10, 2  ;;  %v2665_v31 = vadd.f32 %v936_v23, %v935_v21 }
 0x2ed   :  { %v1017_v9 = vadd.f32 %v1009_v22, %v2841_v58  ;;  %v1016_v63 = vadd.f32 %v1008_v49, %v2842_v25  ;;  %v1077_v49 = vrot.slane %v2665_v31, 6 }
 0x2ef   :  { %v1970_v36 = vmul.f32 -1.442695, %v1017_v9 }
 0x2f0   :  { %v2107_v51 = vpop.eup %2106 }
 0x2f1   :  { %v2109_v26 = vpop.eup %2108  ;;  %v1021_v46 = vadd.f32 1.0, %v2107_v51  ;;  %2110 = vpow2.f32 %v1970_v36 }
 0x2f2   :  { %v1040_v0 = vadd.f32 1.0, %v2109_v26  ;;  %v987_v48 = vpop.f32.mrf.mxu2  ;;  %v1000_v52 = vpop.f32.mrf.mxu3 }
 0x2f3   :  { %2112 = vrcp.f32 %v1021_v46  ;;  %v1033_v22 = vand.u32 2147483648, %v1021_v46  ;;  %v1031_v8 = vand.u32 2147483647, %v1021_v46  ;;  %vm1027_vm6 = vweird.f32 %v1021_v46 }
 0x2f4   :  { %2114 = vrcp.f32 %v1040_v0  ;;  %v1052_v30 = vand.u32 2147483648, %v1040_v0  ;;  %v1050_v9 = vand.u32 2147483647, %v1040_v0  ;;  %vm1046_vm7 = vweird.f32 %v1040_v0 }
 0x2f5   :  { %v1034_v35 = vor.u32 1.1754944e-38, %v1033_v22  ;;  %vm1032_vm10 = vcmp.eq.f32.partialorder %v1031_v8, 8.507059e+37 }
 0x2f6   :  { %v1053_v48 = vor.u32 1.1754944e-38, %v1052_v30  ;;  %vm1051_vm11 = vcmp.eq.f32.partialorder %v1050_v9, 8.507059e+37  ;;  %v1089_v30 = vrot.slane %v2620_v34, 6 }
 0x2f7   :  { %v2111_v32 = vpop.eup %2110 }
 0x2f8   :  { %v1060_v24 = vadd.f32 1.0, %v2111_v32  ;;  %v1091_v9 = vmul.f32 %v1089_v30, %v2505_v38 }
 0x2f9   :  { %v2113_v11 = vpop.eup %2112 }
 0x2fa   :  { %v2115_v19 = vpop.eup %2114  ;;  %v1023_v4 = vmul.f32 %v2113_v11, %v1021_v46  ;;  %2116 = vrcp.f32 %v1060_v24  ;;  %vm1028_vm4 = vweird.f32 %v2113_v11  ;;  %vm1066_vm13 = vweird.f32 %v1060_v24 }
 0x2fb   :  { %v1042_v6 = vmul.f32 %v2115_v19, %v1040_v0  ;;  %2118 = vtanh.f32 %v1016_v63  ;;  %vm1047_vm5 = vweird.f32 %v2115_v19  ;;  %vm1029_vm8 = vmor %vm1027_vm6, %vm1028_vm4 }
 0x2fc   :  { %v1024_v37 = vsub.f32 1.0, %v1023_v4  ;;  %vm1048_vm9 = vmor %vm1046_vm7, %vm1047_vm5 }
 0x2fd   :  { %v1043_v10 = vsub.f32 1.0, %v1042_v6 }
 0x2fe   :  { %v1025_v41 = vmul.f32 %v2113_v11, %v1024_v37 }
 0x2ff   :  { %v1044_v58 = vmul.f32 %v2115_v19, %v1043_v10  ;;  %v1070_v10 = vand.u32 2147483647, %v1060_v24 }
 0x300   :  { %v2117_v36 = vpop.eup %2116  ;;  %v1026_v51 = vadd.f32 %v2113_v11, %v1025_v41 }
 0x301   :  { %v1045_v57 = vadd.f32 %v2115_v19, %v1044_v58  ;;  %v1062_v26 = vmul.f32 %v2117_v36, %v1060_v24  ;;  %v2119_v32 = vpop.eup %2118  ;;  %vm1067_vm12 = vweird.f32 %v2117_v36  ;;  %vm1071_vm15 = vcmp.eq.f32.partialorder %v1070_v10, 8.507059e+37 }
 0x302   :  { %v1030_v52 = vsel %vm1029_vm8, %v2113_v11, %v1026_v51  ;;  %v1072_v11 = vand.u32 2147483648, %v1060_v24  ;;  %vm1068_vm14 = vmor %vm1066_vm13, %vm1067_vm12 }
 0x303   :  { %v1035_v21 = vsel %vm1032_vm10, %v1034_v35, %v1030_v52  ;;  %v1049_v25 = vsel %vm1048_vm9, %v2115_v19, %v1045_v57  ;;  %v1063_v63 = vsub.f32 1.0, %v1062_v26 }
 0x304   :  { %v1054_v4 = vsel %vm1051_vm11, %v1053_v48, %v1049_v25  ;;  %v1080_v23 = vmul.f32 %v2119_v32, %v1035_v21  ;;  %v1073_v19 = vor.u32 1.1754944e-38, %v1072_v11  ;;  %v2843_v48 = vld [vmem:[#allocation12_spill] sm:$0xff]  ;;  %v2844_v32 = vld [vmem:[#allocation13_spill] sm:$0xff] }
 0x305   :  { %v1079_v46 = vmul.f32 %v1077_v49, %v1054_v4  ;;  %v1064_v0 = vmul.f32 %v2117_v36, %v1063_v63 }
 0x307   :  { %v2670_v6 = vadd.f32 %v1080_v23, %v1079_v46  ;;  %v1065_v37 = vadd.f32 %v2117_v36, %v1064_v0  ;;  %v2845_v46 = vld [vmem:[#allocation14_spill] sm:$0xff] }
 0x309   :  { %2120 = vtanh.f32 %v2670_v6  ;;  %v1069_v22 = vsel %vm1068_vm14, %v2117_v36, %v1065_v37 }
 0x30a   :  { %v1074_v8 = vsel %vm1071_vm15, %v1073_v19, %v1069_v22 }
 0x30f   :  { %v2121_v41 = vpop.eup %2120 }
 0x310   :  { %v1083_v58 = vmul.f32 %v2121_v41, %v1074_v8 }
 0x312   :  { %v1087_v51 = vmul.f32 %v1083_v58, %v2503_v56 }
 0x314   :  { %v2676_v35 = vadd.f32 %v1091_v9, %v1087_v51  ;;  %v1093_v57 = vpack.c.bf16 %v1087_v51, %v1087_v51 }
 0x316   :  { %1094 = vst [vmem:[#allocation8] sm:$0x8] %v1093_v57  ;;  %v1095_v24 = vpack.c.bf16 %v2676_v35, %v2676_v35 }
 0x318   :  { %v1097_v26 = vrot.slane %v1095_v24, 3  ;;  %v1084_v24 = vmul.f32 %v2670_v6, %v2503_v56 }
 0x31a   :  { %1107 = vmatmul.bf16.vlgmr.msrb.gmra.mxu0 %v1097_v26  ;;  %1120 = vmatmul.bf16.vlgmr.msrb.gmra.mxu1 %v1097_v26 }
 0x31b   :  { %1133 = vmatmul.bf16.vlgmr.msrb.gmra.mxu2 %v1097_v26  ;;  %1146 = vmatmul.bf16.vlgmr.msrb.gmra.mxu3 %v1097_v26  ;;  %v2846_v26 = vld [vmem:[#allocation15_spill] sm:$0xff] }
 0x31c   :  { %1393 = vmatpush.bf16.msrb.mxu0 %v2308_v40  ;;  %1406 = vmatpush.bf16.msrb.mxu1 %v2310_v42 }
 0x31d   :  { %1419 = vmatpush.bf16.msrb.mxu2 %v2314_v47  ;;  %1432 = vmatpush.bf16.msrb.mxu3 %v2312_v43 }
 0x320   :  { %1394 = vmatpush.bf16.msrb.mxu0 %v2320_v53  ;;  %1407 = vmatpush.bf16.msrb.mxu1 %v2324_v54 }
 0x321   :  { %1420 = vmatpush.bf16.msrb.mxu2 %v2329_v59  ;;  %1433 = vmatpush.bf16.msrb.mxu3 %v2326_v55 }
 0x324   :  { %1395 = vmatpush.bf16.msrb.mxu0 %v2332_v1  ;;  %1408 = vmatpush.bf16.msrb.mxu1 %v2336_v2 }
 0x325   :  { %1421 = vmatpush.bf16.msrb.mxu2 %v2341_v7  ;;  %1434 = vmatpush.bf16.msrb.mxu3 %v2338_v3 }
 0x328   :  { %1396 = vmatpush.bf16.msrb.mxu0 %v2344_v13  ;;  %1409 = vmatpush.bf16.msrb.mxu1 %v2348_v15 }
 0x329   :  { %1422 = vmatpush.bf16.msrb.mxu2 %v2353_v20  ;;  %1435 = vmatpush.bf16.msrb.mxu3 %v2350_v16 }
 0x32c   :  { %1397 = vmatpush.bf16.msrb.mxu0 %v2361_v27  ;;  %1410 = vmatpush.bf16.msrb.mxu1 %v2365_v28 }
 0x32d   :  { %1423 = vmatpush.bf16.msrb.mxu2 %v2370_v33  ;;  %1436 = vmatpush.bf16.msrb.mxu3 %v2367_v29 }
 0x330   :  { %1398 = vmatpush.bf16.msrb.mxu0 %v2373_v39  ;;  %1411 = vmatpush.bf16.msrb.mxu1 %v2377_v44 }
 0x331   :  { %1424 = vmatpush.bf16.msrb.mxu2 %v2382_v50  ;;  %1437 = vmatpush.bf16.msrb.mxu3 %v2379_v45 }
 0x334   :  { %1399 = vmatpush.bf16.msrb.mxu0 %v2385_v60  ;;  %1412 = vmatpush.bf16.msrb.mxu1 %v2389_v61 }
 0x335   :  { %1425 = vmatpush.bf16.msrb.mxu2 %v2394_v5  ;;  %1438 = vmatpush.bf16.msrb.mxu3 %v2391_v62 }
 0x338   :  { %1400 = vmatpush.bf16.msrb.mxu0 %v2397_v12  ;;  %1413 = vmatpush.bf16.msrb.mxu1 %v2401_v14 }
 0x339   :  { %1426 = vmatpush.bf16.msrb.mxu2 %v2406_v18  ;;  %1439 = vmatpush.bf16.msrb.mxu3 %v2403_v17 }
 0x397   :  { %v1108_v34 = vpop.f32.mrf.mxu0  ;;  %v1121_v36 = vpop.f32.mrf.mxu1 }
 0x398   :  { %v1151_v52 = vadd.f32 %v1108_v34, %v2843_v48  ;;  %v1152_v21 = vadd.f32 %v1121_v36, %v2844_v32 }
 0x39a   :  { %v1971_v25 = vmul.f32 -1.442695, %v1151_v52  ;;  %v1972_v63 = vmul.f32 -1.442695, %v1152_v21  ;;  %v1085_v21 = vmul.f32 %v1077_v49, %v2505_v38 }
 0x39c   :  { %2122 = vpow2.f32 %v1971_v25 }
 0x39d   :  { %2124 = vpow2.f32 %v1972_v63 }
 0x39e   :  { %v1134_v4 = vpop.f32.mrf.mxu2  ;;  %v1147_v23 = vpop.f32.mrf.mxu3 }
 0x39f   :  { %v1154_v0 = vadd.f32 %v1147_v23, %v2845_v46  ;;  %v1110_v37 = vpop.f32.mrf.mxu0  ;;  %v1123_v11 = vpop.f32.mrf.mxu1  ;;  %v1153_v34 = vadd.f32 %v1134_v4, %v2846_v26  ;;  %v2721_v23 = vadd.f32 %v1085_v21, %v1084_v24 }
 0x3a1   :  { %v1973_v10 = vmul.f32 -1.442695, %v1154_v0 }
 0x3a2   :  { %v2123_v22 = vpop.eup %2122 }
 0x3a3   :  { %v2125_v19 = vpop.eup %2124  ;;  %v1158_v30 = vadd.f32 1.0, %v2123_v22  ;;  %2126 = vpow2.f32 %v1973_v10 }
 0x3a4   :  { %v1177_v41 = vadd.f32 1.0, %v2125_v19 }
 0x3a5   :  { %2128 = vrcp.f32 %v1158_v30  ;;  %v1170_v37 = vand.u32 2147483648, %v1158_v30  ;;  %v1168_v56 = vand.u32 2147483647, %v1158_v30  ;;  %vm1164_vm2 = vweird.f32 %v1158_v30 }
 0x3a6   :  { %2130 = vrcp.f32 %v1177_v41  ;;  %v1136_v8 = vpop.f32.mrf.mxu2  ;;  %v1149_v58 = vpop.f32.mrf.mxu3  ;;  %v1189_v11 = vand.u32 2147483648, %v1177_v41  ;;  %v1187_v4 = vand.u32 2147483647, %v1177_v41  ;;  %vm1183_vm3 = vweird.f32 %v1177_v41 }
 0x3a7   :  { %v1171_v38 = vor.u32 1.1754944e-38, %v1170_v37  ;;  %v1214_v8 = vrot.slane %v2721_v23, 6  ;;  %vm1169_vm6 = vcmp.eq.f32.partialorder %v1168_v56, 8.507059e+37 }
 0x3a8   :  { %v1190_v58 = vor.u32 1.1754944e-38, %v1189_v11  ;;  %vm1188_vm7 = vcmp.eq.f32.partialorder %v1187_v4, 8.507059e+37 }
 0x3a9   :  { %v2127_v9 = vpop.eup %2126 }
 0x3aa   :  { %v1197_v51 = vadd.f32 1.0, %v2127_v9 }
 0x3ab   :  { %v2129_v57 = vpop.eup %2128 }
 0x3ac   :  { %v2131_v36 = vpop.eup %2130  ;;  %v1160_v52 = vmul.f32 %v2129_v57, %v1158_v30  ;;  %2132 = vrcp.f32 %v1197_v51  ;;  %vm1165_vm0 = vweird.f32 %v2129_v57  ;;  %vm1203_vm9 = vweird.f32 %v1197_v51 }
 0x3ad   :  { %v1179_v25 = vmul.f32 %v2131_v36, %v1177_v41  ;;  %2134 = vtanh.f32 %v1153_v34  ;;  %vm1184_vm1 = vweird.f32 %v2131_v36  ;;  %vm1166_vm4 = vmor %vm1164_vm2, %vm1165_vm0  ;;  %v1207_v11 = vand.u32 2147483647, %v1197_v51 }
 0x3ae   :  { %v1161_v63 = vsub.f32 1.0, %v1160_v52  ;;  %vm1185_vm5 = vmor %vm1183_vm3, %vm1184_vm1 }
 0x3af   :  { %v1180_v0 = vsub.f32 1.0, %v1179_v25  ;;  %vm1208_vm11 = vcmp.eq.f32.partialorder %v1207_v11, 8.507059e+37 }
 0x3b0   :  { %v1162_v10 = vmul.f32 %v2129_v57, %v1161_v63 }
 0x3b1   :  { %v1181_v6 = vmul.f32 %v2131_v36, %v1180_v0  ;;  %v2726_v0 = vpop.permute.xlu1 %1223 }
 0x3b2   :  { %v2133_v22 = vpop.eup %2132  ;;  %v1163_v19 = vadd.f32 %v2129_v57, %v1162_v10 }
 0x3b3   :  { %v1182_v31 = vadd.f32 %v2131_v36, %v1181_v6  ;;  %v1199_v49 = vmul.f32 %v2133_v22, %v1197_v51  ;;  %v2135_v24 = vpop.eup %2134  ;;  %vm1204_vm8 = vweird.f32 %v2133_v22  ;;  %v1237_v6 = vrot.slane %v2676_v35, 6 }
 0x3b4   :  { %v1167_v9 = vsel %vm1166_vm4, %v2129_v57, %v1163_v19  ;;  %v1209_v57 = vand.u32 2147483648, %v1197_v51  ;;  %vm1205_vm10 = vmor %vm1203_vm9, %vm1204_vm8 }
 0x3b5   :  { %v1172_v34 = vsel %vm1169_vm6, %v1171_v38, %v1167_v9  ;;  %v1186_v52 = vsel %vm1185_vm5, %v2131_v36, %v1182_v31  ;;  %v1200_v21 = vsub.f32 1.0, %v1199_v49 }
 0x3b6   :  { %v1191_v25 = vsel %vm1188_vm7, %v1190_v58, %v1186_v52  ;;  %v1217_v63 = vmul.f32 %v2135_v24, %v1172_v34  ;;  %v1210_v56 = vor.u32 1.1754944e-38, %v1209_v57 }
 0x3b7   :  { %v1216_v30 = vmul.f32 %v1214_v8, %v1191_v25  ;;  %v1201_v41 = vmul.f32 %v2133_v22, %v1200_v21 }
 0x3b9   :  { %v2728_v37 = vadd.f32 %v1217_v63, %v1216_v30  ;;  %v1202_v10 = vadd.f32 %v2133_v22, %v1201_v41  ;;  %v2732_v31 = vpop.permute.xlu1 %1230 }
 0x3ba   :  { %v1239_v49 = vmul.f32 %v1237_v6, %v2732_v31 }
 0x3bb   :  { %2136 = vtanh.f32 %v2728_v37  ;;  %v1206_v36 = vsel %vm1205_vm10, %v2133_v22, %v1202_v10 }
 0x3bc   :  { %v1211_v19 = vsel %vm1208_vm11, %v1210_v56, %v1206_v36 }
 0x3c1   :  { %v2137_v4 = vpop.eup %2136 }
 0x3c2   :  { %v1220_v38 = vmul.f32 %v2137_v4, %v1211_v19 }
 0x3c4   :  { %v1235_v58 = vmul.f32 %v2726_v0, %v1220_v38 }
 0x3c6   :  { %v2736_v9 = vadd.f32 %v1239_v49, %v1235_v58  ;;  %v1241_v24 = vpack.c.bf16 %v1235_v58, %v1235_v58 }
 0x3c8   :  { %1242 = vst [vmem:[#allocation8 + $0x4] sm:$0x1] %v1241_v24  ;;  %v1243_v51 = vpack.c.bf16 %v2736_v9, %v2736_v9 }
 0x3ca   :  { %1252 = vmatmul.bf16.vlgmr.msra.gmra.mxu0 %v1243_v51  ;;  %1265 = vmatmul.bf16.vlgmr.msra.gmra.mxu1 %v1243_v51 }
 0x3cb   :  { %1278 = vmatmul.bf16.vlgmr.msra.gmra.mxu2 %v1243_v51  ;;  %1291 = vmatmul.bf16.vlgmr.msra.gmra.mxu3 %v1243_v51 }
 0x3cc   :  { %1542 = vmatpush.bf16.msra.mxu0 %v2308_v40  ;;  %1555 = vmatpush.bf16.msra.mxu1 %v2310_v42 }
 0x3cd   :  { %1568 = vmatpush.bf16.msra.mxu2 %v2314_v47  ;;  %1581 = vmatpush.bf16.msra.mxu3 %v2312_v43 }
 0x3d0   :  { %1543 = vmatpush.bf16.msra.mxu0 %v2320_v53  ;;  %1556 = vmatpush.bf16.msra.mxu1 %v2324_v54 }
 0x3d1   :  { %1569 = vmatpush.bf16.msra.mxu2 %v2329_v59  ;;  %1582 = vmatpush.bf16.msra.mxu3 %v2326_v55 }
 0x3d4   :  { %1544 = vmatpush.bf16.msra.mxu0 %v2332_v1  ;;  %1557 = vmatpush.bf16.msra.mxu1 %v2336_v2 }
 0x3d5   :  { %1570 = vmatpush.bf16.msra.mxu2 %v2341_v7  ;;  %1583 = vmatpush.bf16.msra.mxu3 %v2338_v3 }
 0x3d8   :  { %1545 = vmatpush.bf16.msra.mxu0 %v2344_v13  ;;  %1558 = vmatpush.bf16.msra.mxu1 %v2348_v15 }
 0x3d9   :  { %1571 = vmatpush.bf16.msra.mxu2 %v2353_v20  ;;  %1584 = vmatpush.bf16.msra.mxu3 %v2350_v16 }
 0x3dc   :  { %1546 = vmatpush.bf16.msra.mxu0 %v2361_v27  ;;  %1559 = vmatpush.bf16.msra.mxu1 %v2365_v28 }
 0x3dd   :  { %1572 = vmatpush.bf16.msra.mxu2 %v2370_v33  ;;  %1585 = vmatpush.bf16.msra.mxu3 %v2367_v29 }
 0x3e0   :  { %1547 = vmatpush.bf16.msra.mxu0 %v2373_v39  ;;  %1560 = vmatpush.bf16.msra.mxu1 %v2377_v44 }
 0x3e1   :  { %1573 = vmatpush.bf16.msra.mxu2 %v2382_v50  ;;  %1586 = vmatpush.bf16.msra.mxu3 %v2379_v45 }
 0x3e4   :  { %1548 = vmatpush.bf16.msra.mxu0 %v2385_v60  ;;  %1561 = vmatpush.bf16.msra.mxu1 %v2389_v61  ;;  %v1226_v61 = vmul.f32 %v2726_v0, %v2728_v37 }
 0x3e5   :  { %1574 = vmatpush.bf16.msra.mxu2 %v2394_v5  ;;  %1587 = vmatpush.bf16.msra.mxu3 %v2391_v62 }
 0x3e8   :  { %1549 = vmatpush.bf16.msra.mxu0 %v2397_v12  ;;  %1562 = vmatpush.bf16.msra.mxu1 %v2401_v14  ;;  %v1233_v14 = vmul.f32 %v2732_v31, %v1214_v8 }
 0x3e9   :  { %1575 = vmatpush.bf16.msra.mxu2 %v2406_v18  ;;  %1588 = vmatpush.bf16.msra.mxu3 %v2403_v17 }
 0x3ea   :  { %v2781_v35 = vadd.f32 %v1233_v14, %v1226_v61 }
 0x3ec   :  { %v1371_v57 = vrot.slane %v2781_v35, 6 }
 0x447   :  { %v1253_v40 = vpop.f32.mrf.mxu0  ;;  %v1266_v42 = vpop.f32.mrf.mxu1 }
 0x448   :  { %v1300_v43 = vrot.slane %v1253_v40, 6  ;;  %v1301_v47 = vrot.slane %v1266_v42, 6 }
 0x44a   :  { %v1308_v53 = vadd.f32 %v1300_v43, %v2843_v48  ;;  %v1309_v54 = vadd.f32 %v1301_v47, %v2844_v32 }
 0x44c   :  { %v1974_v55 = vmul.f32 -1.442695, %v1308_v53  ;;  %v1975_v59 = vmul.f32 -1.442695, %v1309_v54  ;;  %v1383_v54 = vrot.slane %v2736_v9, 6 }
 0x44e   :  { %2138 = vpow2.f32 %v1974_v55  ;;  %v1279_v1 = vpop.f32.mrf.mxu2  ;;  %v1292_v2 = vpop.f32.mrf.mxu3 }
 0x44f   :  { %2140 = vpow2.f32 %v1975_v59  ;;  %v1303_v3 = vrot.slane %v1292_v2, 6  ;;  %v1255_v7 = vpop.f32.mrf.mxu0  ;;  %v1268_v13 = vpop.f32.mrf.mxu1  ;;  %v1302_v44 = vrot.slane %v1279_v1, 6 }
 0x451   :  { %v1311_v15 = vadd.f32 %v1303_v3, %v2845_v46  ;;  %v1310_v62 = vadd.f32 %v1302_v44, %v2846_v26  ;;  %v1385_v3 = vmul.f32 %v1383_v54, %v2732_v31 }
 0x453   :  { %v1976_v16 = vmul.f32 -1.442695, %v1311_v15 }
 0x454   :  { %v2139_v20 = vpop.eup %2138 }
 0x455   :  { %v2141_v27 = vpop.eup %2140  ;;  %v1315_v28 = vadd.f32 1.0, %v2139_v20  ;;  %2142 = vpow2.f32 %v1976_v16 }
 0x456   :  { %v1334_v29 = vadd.f32 1.0, %v2141_v27  ;;  %v1281_v33 = vpop.f32.mrf.mxu2  ;;  %v1294_v39 = vpop.f32.mrf.mxu3 }
 0x457   :  { %2144 = vrcp.f32 %v1315_v28  ;;  %v1327_v34 = vand.u32 2147483648, %v1315_v28  ;;  %v1325_v25 = vand.u32 2147483647, %v1315_v28  ;;  %vm1321_vm14 = vweird.f32 %v1315_v28 }
 0x458   :  { %2146 = vrcp.f32 %v1334_v29  ;;  %v1346_v52 = vand.u32 2147483648, %v1334_v29  ;;  %v1344_v30 = vand.u32 2147483647, %v1334_v29  ;;  %vm1340_vm15 = vweird.f32 %v1334_v29 }
 0x459   :  { %v1328_v23 = vor.u32 1.1754944e-38, %v1327_v34  ;;  %vm1326_vm2 = vcmp.eq.f32.partialorder %v1325_v25, 8.507059e+37 }
 0x45a   :  { %v1347_v11 = vor.u32 1.1754944e-38, %v1346_v52  ;;  %vm1345_vm3 = vcmp.eq.f32.partialorder %v1344_v30, 8.507059e+37 }
 0x45b   :  { %v2143_v45 = vpop.eup %2142 }
 0x45c   :  { %v1354_v50 = vadd.f32 1.0, %v2143_v45 }
 0x45d   :  { %v2145_v60 = vpop.eup %2144 }
 0x45e   :  { %v2147_v5 = vpop.eup %2146  ;;  %v1317_v12 = vmul.f32 %v2145_v60, %v1315_v28  ;;  %2148 = vrcp.f32 %v1354_v50  ;;  %vm1322_vm12 = vweird.f32 %v2145_v60  ;;  %v1366_v42 = vand.u32 2147483648, %v1354_v50 }
 0x45f   :  { %v1336_v17 = vmul.f32 %v2147_v5, %v1334_v29  ;;  %2150 = vtanh.f32 %v1310_v62  ;;  %vm1341_vm13 = vweird.f32 %v2147_v5  ;;  %vm1323_vm0 = vmor %vm1321_vm14, %vm1322_vm12  ;;  %vm1360_vm5 = vweird.f32 %v1354_v50 }
 0x460   :  { %v1318_v18 = vsub.f32 1.0, %v1317_v12  ;;  %vm1342_vm1 = vmor %vm1340_vm15, %vm1341_vm13  ;;  %v1364_v43 = vand.u32 2147483647, %v1354_v50  ;;  %v1367_v53 = vor.u32 1.1754944e-38, %v1366_v42 }
 0x461   :  { %v1337_v22 = vsub.f32 1.0, %v1336_v17 }
 0x462   :  { %v1319_v21 = vmul.f32 %v2145_v60, %v1318_v18  ;;  %vm1365_vm7 = vcmp.eq.f32.partialorder %v1364_v43, 8.507059e+37 }
 0x463   :  { %v1338_v63 = vmul.f32 %v2147_v5, %v1337_v22 }
 0x464   :  { %v2149_v41 = vpop.eup %2148  ;;  %v1320_v37 = vadd.f32 %v2145_v60, %v1319_v21 }
 0x465   :  { %v1339_v8 = vadd.f32 %v2147_v5, %v1338_v63  ;;  %v1356_v10 = vmul.f32 %v2149_v41, %v1354_v50  ;;  %v2151_v56 = vpop.eup %2150  ;;  %vm1361_vm4 = vweird.f32 %v2149_v41 }
 0x466   :  { %v1324_v36 = vsel %vm1323_vm0, %v2145_v60, %v1320_v37  ;;  %vm1362_vm6 = vmor %vm1360_vm5, %vm1361_vm4 }
 0x467   :  { %v1329_v6 = vsel %vm1326_vm2, %v1328_v23, %v1324_v36  ;;  %v1343_v4 = vsel %vm1342_vm1, %v2147_v5, %v1339_v8  ;;  %v1357_v19 = vsub.f32 1.0, %v1356_v10  ;;  %v1379_v10 = vmul.f32 %v1371_v57, %v2732_v31 }
 0x468   :  { %v1348_v38 = vsel %vm1345_vm3, %v1347_v11, %v1343_v4  ;;  %v1374_v49 = vmul.f32 %v2151_v56, %v1329_v6 }
 0x469   :  { %v1373_v58 = vmul.f32 %v1371_v57, %v1348_v38  ;;  %v1358_v24 = vmul.f32 %v2149_v41, %v1357_v19 }
 0x46b   :  { %v1375_v51 = vadd.f32 %v1374_v49, %v1373_v58  ;;  %v1359_v40 = vadd.f32 %v2149_v41, %v1358_v24 }
 0x46d   :  { %2152 = vtanh.f32 %v1375_v51  ;;  %v1363_v47 = vsel %vm1362_vm6, %v2149_v41, %v1359_v40  ;;  %v1378_v41 = vmul.f32 %v1375_v51, %v2726_v0 }
 0x46e   :  { %v1368_v59 = vsel %vm1365_vm7, %v1367_v53, %v1363_v47 }
 0x46f   :  { %v2801_v56 = vadd.f32 %v1379_v10, %v1378_v41 }
 0x471   :  { %v1520_v53 = vrot.slane %v2801_v56, 6 }
 0x473   :  { %v2153_v55 = vpop.eup %2152 }
 0x474   :  { %v1377_v1 = vmul.f32 %v2153_v55, %v1368_v59 }
 0x476   :  { %v1381_v2 = vmul.f32 %v1377_v1, %v2726_v0 }
 0x478   :  { %v2789_v7 = vadd.f32 %v1385_v3, %v1381_v2  ;;  %v1387_v13 = vpack.c.bf16 %v1381_v2, %v1381_v2 }
 0x47a   :  { %1388 = vst [vmem:[#allocation8 + $0x4] sm:$0x2] %v1387_v13  ;;  %v1389_v15 = vpack.c.bf16 %v2789_v7, %v2789_v7 }
 0x47c   :  { %v1391_v16 = vrot.slane %v1389_v15, 1 }
 0x47e   :  { %1401 = vmatmul.bf16.vlgmr.msrb.gmra.mxu0 %v1391_v16  ;;  %1414 = vmatmul.bf16.vlgmr.msrb.gmra.mxu1 %v1391_v16 }
 0x47f   :  { %1427 = vmatmul.bf16.vlgmr.msrb.gmra.mxu2 %v1391_v16  ;;  %1440 = vmatmul.bf16.vlgmr.msrb.gmra.mxu3 %v1391_v16 }
 0x4fb   :  { %v1402_v9 = vpop.f32.mrf.mxu0  ;;  %v1415_v20 = vpop.f32.mrf.mxu1 }
 0x4fc   :  { %v1449_v27 = vrot.slane %v1402_v9, 4  ;;  %v1450_v28 = vrot.slane %v1415_v20, 4 }
 0x4fe   :  { %v1457_v29 = vadd.f32 %v1449_v27, %v2843_v48  ;;  %v1458_v33 = vadd.f32 %v1450_v28, %v2844_v32 }
 0x500   :  { %v1977_v39 = vmul.f32 -1.442695, %v1457_v29  ;;  %v1978_v44 = vmul.f32 -1.442695, %v1458_v33  ;;  %v1532_v33 = vrot.slane %v2789_v7, 6 }
 0x502   :  { %2154 = vpow2.f32 %v1977_v39  ;;  %v1428_v45 = vpop.f32.mrf.mxu2  ;;  %v1441_v50 = vpop.f32.mrf.mxu3 }
 0x503   :  { %2156 = vpow2.f32 %v1978_v44  ;;  %v1452_v60 = vrot.slane %v1441_v50, 4  ;;  %v1404_v61 = vpop.f32.mrf.mxu0  ;;  %v1417_v62 = vpop.f32.mrf.mxu1  ;;  %v1451_v21 = vrot.slane %v1428_v45, 4 }
 0x505   :  { %v1460_v5 = vadd.f32 %v1452_v60, %v2845_v46  ;;  %v1459_v37 = vadd.f32 %v1451_v21, %v2846_v26  ;;  %v1534_v60 = vmul.f32 %v1532_v33, %v2732_v31 }
 0x507   :  { %v1979_v12 = vmul.f32 -1.442695, %v1460_v5 }
 0x508   :  { %v2155_v14 = vpop.eup %2154 }
 0x509   :  { %v2157_v17 = vpop.eup %2156  ;;  %v1464_v18 = vadd.f32 1.0, %v2155_v14  ;;  %2158 = vpow2.f32 %v1979_v12 }
 0x50a   :  { %v1483_v22 = vadd.f32 1.0, %v2157_v17  ;;  %v1430_v34 = vpop.f32.mrf.mxu2  ;;  %v1443_v52 = vpop.f32.mrf.mxu3 }
 0x50b   :  { %2160 = vrcp.f32 %v1464_v18  ;;  %v1476_v4 = vand.u32 2147483648, %v1464_v18  ;;  %v1474_v49 = vand.u32 2147483647, %v1464_v18  ;;  %vm1470_vm10 = vweird.f32 %v1464_v18 }
 0x50c   :  { %2162 = vrcp.f32 %v1483_v22  ;;  %v1495_v19 = vand.u32 2147483648, %v1483_v22  ;;  %v1493_v24 = vand.u32 2147483647, %v1483_v22  ;;  %vm1489_vm11 = vweird.f32 %v1483_v22 }
 0x50d   :  { %v1477_v35 = vor.u32 1.1754944e-38, %v1476_v4  ;;  %vm1475_vm14 = vcmp.eq.f32.partialorder %v1474_v49, 8.507059e+37 }
 0x50e   :  { %v1496_v43 = vor.u32 1.1754944e-38, %v1495_v19  ;;  %vm1494_vm15 = vcmp.eq.f32.partialorder %v1493_v24, 8.507059e+37 }
 0x50f   :  { %v2159_v25 = vpop.eup %2158 }
 0x510   :  { %v1503_v63 = vadd.f32 1.0, %v2159_v25 }
 0x511   :  { %v2161_v30 = vpop.eup %2160 }
 0x512   :  { %v2163_v23 = vpop.eup %2162  ;;  %v1466_v8 = vmul.f32 %v2161_v30, %v1464_v18  ;;  %2164 = vrcp.f32 %v1503_v63  ;;  %vm1471_vm8 = vweird.f32 %v2161_v30  ;;  %v1515_v20 = vand.u32 2147483648, %v1503_v63 }
 0x513   :  { %v1485_v11 = vmul.f32 %v2163_v23, %v1483_v22  ;;  %2166 = vtanh.f32 %v1459_v37  ;;  %vm1490_vm9 = vweird.f32 %v2163_v23  ;;  %vm1472_vm12 = vmor %vm1470_vm10, %vm1471_vm8  ;;  %vm1509_vm1 = vweird.f32 %v1503_v63 }
 0x514   :  { %v1467_v36 = vsub.f32 1.0, %v1466_v8  ;;  %vm1491_vm13 = vmor %vm1489_vm11, %vm1490_vm9  ;;  %v1513_v27 = vand.u32 2147483647, %v1503_v63  ;;  %v1516_v29 = vor.u32 1.1754944e-38, %v1515_v20 }
 0x515   :  { %v1486_v6 = vsub.f32 1.0, %v1485_v11 }
 0x516   :  { %v1468_v38 = vmul.f32 %v2161_v30, %v1467_v36  ;;  %vm1514_vm3 = vcmp.eq.f32.partialorder %v1513_v27, 8.507059e+37 }
 0x517   :  { %v1487_v58 = vmul.f32 %v2163_v23, %v1486_v6 }
 0x518   :  { %v2165_v51 = vpop.eup %2164  ;;  %v1469_v40 = vadd.f32 %v2161_v30, %v1468_v38 }
 0x519   :  { %v1488_v57 = vadd.f32 %v2163_v23, %v1487_v58  ;;  %v1505_v42 = vmul.f32 %v2165_v51, %v1503_v63  ;;  %v2167_v54 = vpop.eup %2166  ;;  %vm1510_vm0 = vweird.f32 %v2165_v51 }
 0x51a   :  { %v1473_v47 = vsel %vm1472_vm12, %v2161_v30, %v1469_v40  ;;  %vm1511_vm2 = vmor %vm1509_vm1, %vm1510_vm0  ;;  %v1528_v40 = vmul.f32 %v1520_v53, %v2732_v31 }
 0x51b   :  { %v1478_v55 = vsel %vm1475_vm14, %v1477_v35, %v1473_v47  ;;  %v1492_v59 = vsel %vm1491_vm13, %v2163_v23, %v1488_v57  ;;  %v1506_v1 = vsub.f32 1.0, %v1505_v42 }
 0x51c   :  { %v1497_v2 = vsel %vm1494_vm15, %v1496_v43, %v1492_v59  ;;  %v1523_v3 = vmul.f32 %v2167_v54, %v1478_v55 }
 0x51d   :  { %v1522_v13 = vmul.f32 %v1520_v53, %v1497_v2  ;;  %v1507_v15 = vmul.f32 %v2165_v51, %v1506_v1 }
 0x51f   :  { %v1524_v16 = vadd.f32 %v1523_v3, %v1522_v13  ;;  %v1508_v9 = vadd.f32 %v2165_v51, %v1507_v15 }
 0x521   :  { %2168 = vtanh.f32 %v1524_v16  ;;  %v1512_v28 = vsel %vm1511_vm2, %v2165_v51, %v1508_v9  ;;  %v1527_v58 = vmul.f32 %v1524_v16, %v2726_v0 }
 0x522   :  { %v1517_v44 = vsel %vm1514_vm3, %v1516_v29, %v1512_v28 }
 0x523   :  { %v1529_v42 = vadd.f32 %v1528_v40, %v1527_v58 }
 0x525   :  { %v1669_v16 = vrot.slane %v1529_v42, 6 }
 0x527   :  { %v2169_v39 = vpop.eup %2168 }
 0x528   :  { %v1526_v45 = vmul.f32 %v2169_v39, %v1517_v44 }
 0x52a   :  { %v1530_v50 = vmul.f32 %v1526_v45, %v2726_v0 }
 0x52c   :  { %v1535_v61 = vadd.f32 %v1534_v60, %v1530_v50  ;;  %v1536_v62 = vpack.c.bf16 %v1530_v50, %v1530_v50 }
 0x52e   :  { %1537 = vst [vmem:[#allocation8 + $0x4] sm:$0x4] %v1536_v62  ;;  %v1538_v5 = vpack.c.bf16 %v1535_v61, %v1535_v61 }
 0x530   :  { %v1540_v12 = vrot.slane %v1538_v5, 2 }
 0x532   :  { %1550 = vmatmul.bf16.vlgmr.msra.gmra.mxu0 %v1540_v12  ;;  %1563 = vmatmul.bf16.vlgmr.msra.gmra.mxu1 %v1540_v12 }
 0x533   :  { %1576 = vmatmul.bf16.vlgmr.msra.gmra.mxu2 %v1540_v12  ;;  %1589 = vmatmul.bf16.vlgmr.msra.gmra.mxu3 %v1540_v12 }
 0x5af   :  { %v1551_v14 = vpop.f32.mrf.mxu0  ;;  %v1564_v17 = vpop.f32.mrf.mxu1 }
 0x5b0   :  { %v1598_v7 = vrot.slane %v1551_v14, 2  ;;  %v1599_v18 = vrot.slane %v1564_v17, 2 }
 0x5b2   :  { %v1606_v22 = vadd.f32 %v1598_v7, %v2843_v48  ;;  %v1607_v34 = vadd.f32 %v1599_v18, %v2844_v32 }
 0x5b4   :  { %v1980_v52 = vmul.f32 -1.442695, %v1606_v22  ;;  %v1981_v21 = vmul.f32 -1.442695, %v1607_v34 }
 0x5b6   :  { %2170 = vpow2.f32 %v1980_v52  ;;  %v1577_v25 = vpop.f32.mrf.mxu2  ;;  %v1590_v63 = vpop.f32.mrf.mxu3 }
 0x5b7   :  { %2172 = vpow2.f32 %v1981_v21  ;;  %v1601_v30 = vrot.slane %v1590_v63, 2  ;;  %v1553_v41 = vpop.f32.mrf.mxu0  ;;  %v1566_v37 = vpop.f32.mrf.mxu1  ;;  %v1600_v32 = vrot.slane %v1577_v25, 2 }
 0x5b9   :  { %v1609_v23 = vadd.f32 %v1601_v30, %v2845_v46  ;;  %v1608_v24 = vadd.f32 %v1600_v32, %v2846_v26 }
 0x5bb   :  { %v1982_v8 = vmul.f32 -1.442695, %v1609_v23 }
 0x5bc   :  { %v2171_v10 = vpop.eup %2170 }
 0x5bd   :  { %v2173_v11 = vpop.eup %2172  ;;  %v1613_v36 = vadd.f32 1.0, %v2171_v10  ;;  %2174 = vpow2.f32 %v1982_v8 }
 0x5be   :  { %v1632_v6 = vadd.f32 1.0, %v2173_v11  ;;  %v1579_v48 = vpop.f32.mrf.mxu2  ;;  %v1592_v4 = vpop.f32.mrf.mxu3 }
 0x5bf   :  { %2176 = vrcp.f32 %v1613_v36  ;;  %v1625_v47 = vand.u32 2147483648, %v1613_v36  ;;  %v1623_v59 = vand.u32 2147483647, %v1613_v36  ;;  %vm1619_vm6 = vweird.f32 %v1613_v36 }
 0x5c0   :  { %2178 = vrcp.f32 %v1632_v6  ;;  %v1644_v54 = vand.u32 2147483648, %v1632_v6  ;;  %v1642_v26 = vand.u32 2147483647, %v1632_v6  ;;  %vm1638_vm7 = vweird.f32 %v1632_v6 }
 0x5c1   :  { %v1626_v56 = vor.u32 1.1754944e-38, %v1625_v47  ;;  %vm1624_vm10 = vcmp.eq.f32.partialorder %v1623_v59, 8.507059e+37 }
 0x5c2   :  { %v1645_v13 = vor.u32 1.1754944e-38, %v1644_v54  ;;  %vm1643_vm11 = vcmp.eq.f32.partialorder %v1642_v26, 8.507059e+37 }
 0x5c3   :  { %v2175_v19 = vpop.eup %2174 }
 0x5c4   :  { %v1652_v38 = vadd.f32 1.0, %v2175_v19 }
 0x5c5   :  { %v2177_v49 = vpop.eup %2176 }
 0x5c6   :  { %v2179_v51 = vpop.eup %2178  ;;  %v1615_v46 = vmul.f32 %v2177_v49, %v1613_v36  ;;  %2180 = vrcp.f32 %v1652_v38  ;;  %vm1620_vm4 = vweird.f32 %v2177_v49  ;;  %v1664_v60 = vand.u32 2147483648, %v1652_v38 }
 0x5c7   :  { %v1634_v35 = vmul.f32 %v2179_v51, %v1632_v6  ;;  %2182 = vtanh.f32 %v1608_v24  ;;  %vm1639_vm5 = vweird.f32 %v2179_v51  ;;  %vm1621_vm8 = vmor %vm1619_vm6, %vm1620_vm4  ;;  %vm1658_vm13 = vweird.f32 %v1652_v38 }
 0x5c8   :  { %v1616_v57 = vsub.f32 1.0, %v1615_v46  ;;  %vm1640_vm9 = vmor %vm1638_vm7, %vm1639_vm5  ;;  %v1662_v61 = vand.u32 2147483647, %v1652_v38  ;;  %v1665_v5 = vor.u32 1.1754944e-38, %v1664_v60 }
 0x5c9   :  { %v1635_v43 = vsub.f32 1.0, %v1634_v35 }
 0x5ca   :  { %v1617_v55 = vmul.f32 %v2177_v49, %v1616_v57  ;;  %vm1663_vm15 = vcmp.eq.f32.partialorder %v1662_v61, 8.507059e+37 }
 0x5cb   :  { %v1636_v1 = vmul.f32 %v2179_v51, %v1635_v43 }
 0x5cc   :  { %v2181_v2 = vpop.eup %2180  ;;  %v1618_v3 = vadd.f32 %v2177_v49, %v1617_v55 }
 0x5cd   :  { %v1637_v31 = vadd.f32 %v2179_v51, %v1636_v1  ;;  %v1654_v53 = vmul.f32 %v2181_v2, %v1652_v38  ;;  %v2183_v9 = vpop.eup %2182  ;;  %vm1659_vm12 = vweird.f32 %v2181_v2 }
 0x5ce   :  { %v1622_v15 = vsel %vm1621_vm8, %v2177_v49, %v1618_v3  ;;  %vm1660_vm14 = vmor %vm1658_vm13, %vm1659_vm12 }
 0x5cf   :  { %v1627_v20 = vsel %vm1624_vm10, %v1626_v56, %v1622_v15  ;;  %v1641_v27 = vsel %vm1640_vm9, %v2179_v51, %v1637_v31  ;;  %v1655_v28 = vsub.f32 1.0, %v1654_v53 }
 0x5d0   :  { %v1646_v29 = vsel %vm1643_vm11, %v1645_v13, %v1641_v27  ;;  %v1672_v33 = vmul.f32 %v2183_v9, %v1627_v20 }
 0x5d1   :  { %v1671_v39 = vmul.f32 %v1669_v16, %v1646_v29  ;;  %v1656_v44 = vmul.f32 %v2181_v2, %v1655_v28 }
 0x5d3   :  { %v1673_v45 = vadd.f32 %v1672_v33, %v1671_v39  ;;  %v1657_v50 = vadd.f32 %v2181_v2, %v1656_v44 }
 0x5d5   :  { %2184 = vtanh.f32 %v1673_v45  ;;  %v1661_v62 = vsel %vm1660_vm14, %v2181_v2, %v1657_v50 }
 0x5d6   :  { %v1666_v14 = vsel %vm1663_vm15, %v1665_v5, %v1661_v62 }
 0x5db   :  { %v2185_v12 = vpop.eup %2184 }
 0x5dc   :  { %v1675_v17 = vmul.f32 %v2185_v12, %v1666_v14 }
 0x5de   :  { %v1676_v7 = vmul.f32 %v1675_v17, %v2726_v0 }
 0x5e0   :  { %v1677_v18 = vpack.c.bf16 %v1676_v7, %v1676_v7 }
 0x5e2   :  { %1678 = vst [vmem:[#allocation8 + $0x4] sm:$0x8] %v1677_v18 }
 0x5e3   :  { %1691 = dma.vmem_to_hbm [thread:$0]  %s1684_s9, 128, %s1686_s12, [#allocation5], %s2270_s13, %s2270_s13, %s2271_s14  }
 0x5e4   :  { %2262 = dma.done.wait [#allocation5], 128  }
 0x5e5   :  { %2263 = vsyncadd [#allocation5], 4294967168 }
 0x5e6   :  { %1696 = vsyncpa [#allocation4], 1 }
 0x5e7   :  { %1697 = vsyncpa [#allocation7], 1 }
 0x5e8   :  { %1698 = vsyncpa [#allocation5], 1 }

</bundles_post_ra>
